<compile_context>
chip_gen: v7x
topology: tpu7x:2x2x1
jax: 0.10.0
libtpu: 0.0.40
codegen_flags: <defaults>
</compile_context>

<pallas_src>
import numpy as np
import jax
import jax.numpy as jnp
from jax.experimental import pallas as pl
from jax.experimental.pallas import tpu as pltpu

EPS = 1e-5


# ----------------------------------------------------------------------------------
# wrapper-side weight preprocessing (tiny, runs once under jit)
# ----------------------------------------------------------------------------------
def _band_from_taps(w_dy, Wp, Wout):
    """w_dy: (3, Cin, Cout) taps of one kernel row -> banded (Wp*Cin, Wout*Cout) matrix
    with M[(w+dx)*Cin + ic, w*Cout + oc] = w_dy[dx, ic, oc]."""
    _, Cin, Co = w_dy.shape
    taps = np.zeros((3, Wp, Wout), np.float32)
    for dx in range(3):
        taps[dx, np.arange(Wout) + dx, np.arange(Wout)] = 1.0
    m = jnp.einsum("xpq,xio->piqo", jnp.asarray(taps), w_dy.astype(jnp.float32))
    return m.reshape(Wp * Cin, Wout * Co)


def _banded_conv_weights(w, Wp, Wout):
    """w: (3, 3, Cin, Cout) HWIO -> (3, Wp*Cin, Wout*Cout), one banded matrix per dy."""
    return jnp.stack([_band_from_taps(w[dy], Wp, Wout) for dy in range(3)], axis=0)


# ----------------------------------------------------------------------------------
# fused `up.forward(x1, x2)`
# ----------------------------------------------------------------------------------
def up_forward(x1, x2, p):
    """x1: (N, H1, W1, C1) low-res input, x2: (N, H2, W2, C1) skip connection (NHWC)."""
    N, H1, W1, C1 = x1.shape
    N2, H2, W2, C2 = x2.shape
    assert N2 == N and C2 == C1
    Cout = p["w1"].shape[-1]

    # F.pad offsets for the upsampled x1 inside x2's spatial frame (all static).
    diffY, diffX = H2 - 2 * H1, W2 - 2 * W1
    py0, px0 = diffY // 2, diffX // 2
    Hp, Wp = H2 + 2, W2 + 2                 # +2: SAME padding of the 3x3 convs
    NH2 = N * H2
    L1U = 2 * W1 * C1                       # lane width of one upsampled row
    LC1 = Wp * C1                           # lane width of a padded C1 row slab
    LCO = Wp * Cout                         # lane width of a padded Cout row slab
    LOUT = W2 * Cout                        # lane width of one output row
    r0 = 1 + py0                            # first padded row holding up(x1) data
    c0 = (1 + px0) * C1                     # first padded lane holding up(x1) data
    inv_cnt = 1.0 / float(N * H2 * W2)      # 1 / BatchNorm reduction count

    bf16, f32 = jnp.bfloat16, jnp.float32

    # -------- free wrapper-side reshapes + weight preprocessing --------
    x1_rows = x1.reshape(N * H1, W1 * C1)
    x2_rows = jnp.pad(x2, ((0, 0), (1, 1), (1, 1), (0, 0))).reshape(N, Hp, LC1)

    # ConvTranspose2d(C1, C1, 2, stride=2): one block-diagonal matrix per output-row
    # parity `a`, so upsampled rows come out of the MXU already lane-dense.
    wt_r = p["wt"].reshape(C1, 2, 2, C1)                         # (ic, a, b, oc)
    eye_w1 = jnp.eye(W1, dtype=f32)
    wt_ab = jnp.stack(
        [jnp.kron(eye_w1, wt_r[:, a].reshape(C1, 2 * C1)) for a in range(2)], axis=0
    ).astype(bf16)                                               # (2, W1*C1, 2*W1*C1)
    bt_lane = jnp.tile(p["bt"], 2 * W1)[None, :].astype(f32)     # (1, 2*W1*C1)

    # conv1 weight split into the x2 half and the up(x1) half (kills torch.cat),
    # each turned into 3 banded matrices (one per kernel row dy).
    w1a = _banded_conv_weights(p["w1"][:, :, :C1, :], Wp, W2).astype(bf16)   # x2 half
    w1b = _banded_conv_weights(p["w1"][:, :, C1:, :], Wp, W2).astype(bf16)   # up(x1) half
    w2b = _banded_conv_weights(p["w2"], Wp, W2).astype(bf16)

    def lane(v):                                  # per-channel affine -> per-lane vector
        return jnp.tile(v, W2)[None, :].astype(f32)              # (1, W2*Cout)

    b1l, g1l, be1l = lane(p["b1"]), lane(p["g1"]), lane(p["be1"])
    b2l, g2l, be2l = lane(p["b2"]), lane(p["g2"]), lane(p["be2"])

    # 0/1 matrix that folds + re-broadcasts per-channel BN sums along the lane axis:
    # (A @ fold)[r, w*Cout + c] = sum_{w'} A[r, w'*Cout + c]
    q = np.arange(LOUT)
    fold_mat = jnp.asarray((q[:, None] % Cout == q[None, :] % Cout).astype(np.float32))

    # ------------------------------- fused kernel -------------------------------
    def kernel(x1_ref, x2_ref, wtab_ref, btl_ref,
               w1a_ref, w1b_ref, b1_ref, g1_ref, be1_ref,
               w2b_ref, b2_ref, g2_ref, be2_ref, fold_ref,
               o_ref, x1pad_ref, hpad_ref):

        def zero_border(ref, rr0, rr1, cc0, cc1):
            # zero only the border strips around interior rows [rr0, rr1) and
            # lanes [cc0, cc1)  (F.pad region + 3x3 SAME padding).
            n_, hp_, l_ = ref.shape
            if rr0 > 0:
                ref[:, :rr0, :] = jnp.zeros((n_, rr0, l_), ref.dtype)
            if rr1 < hp_:
                ref[:, rr1:, :] = jnp.zeros((n_, hp_ - rr1, l_), ref.dtype)
            if cc0 > 0:
                ref[:, :, :cc0] = jnp.zeros((n_, hp_, cc0), ref.dtype)
            if cc1 < l_:
                ref[:, :, cc1:] = jnp.zeros((n_, hp_, l_ - cc1), ref.dtype)

        def bn_relu(a, g_lane, be_lane):
            # single-pass training-mode batch stats (biased var) in f32; channels live
            # at lanes (w*Cout + c), so the per-channel fold is one tiny 0/1 matmul.
            fold = fold_ref[...]
            s1 = jnp.sum(jnp.dot(a, fold, preferred_element_type=jnp.float32),
                         axis=0, keepdims=True)
            s2 = jnp.sum(jnp.dot(a * a, fold, preferred_element_type=jnp.float32),
                         axis=0, keepdims=True)
            mean = s1 * inv_cnt
            var = jnp.maximum(s2 * inv_cnt - mean * mean, 0.0)
            scale = g_lane * jax.lax.rsqrt(var + EPS)
            return jnp.maximum(a * scale + (be_lane - mean * scale), 0.0)

        # ---- 1. ConvTranspose2d(C1, C1, 2, stride=2) + F.pad, straight into VMEM ----
        zero_border(x1pad_ref, r0, r0 + 2 * H1, c0, c0 + L1U)
        x1b = x1_ref[...].astype(jnp.bfloat16)                       # (N*H1, W1*C1)
        for a in range(2):                                           # output-row parity
            ya = jnp.dot(x1b, wtab_ref[a],
                         preferred_element_type=jnp.float32) + btl_ref[...]
            ya = ya.reshape(N, H1, L1U)
            for i in range(H1):                                      # subpixel row scatter
                x1pad_ref[:, r0 + 2 * i + a, c0:c0 + L1U] = ya[:, i, :]

        # ---- 2. conv1 on the (virtually concatenated) [x2 | up(x1)] input ----
        acc = jnp.zeros((NH2, LOUT), jnp.float32) + b1_ref[...]
        for dy in range(3):
            row2 = x2_ref[:, dy:dy + H2, :].reshape(NH2, LC1).astype(jnp.bfloat16)
            row1 = x1pad_ref[:, dy:dy + H2, :].reshape(NH2, LC1).astype(jnp.bfloat16)
            acc = acc + jnp.dot(row2, w1a_ref[dy], preferred_element_type=jnp.float32)
            acc = acc + jnp.dot(row1, w1b_ref[dy], preferred_element_type=jnp.float32)
        h = bn_relu(acc, g1_ref[...], be1_ref[...])

        # ---- 3. re-pad hidden activation for conv2 (border strips only) ----
        zero_border(hpad_ref, 1, H2 + 1, Cout, Cout + LOUT)
        hpad_ref[:, 1:H2 + 1, Cout:Cout + LOUT] = h.reshape(N, H2, LOUT)

        # ---- 4. conv2 ----
        acc2 = jnp.zeros((NH2, LOUT), jnp.float32) + b2_ref[...]
        for dy in range(3):
            rowh = hpad_ref[:, dy:dy + H2, :].reshape(NH2, LCO).astype(jnp.bfloat16)
            acc2 = acc2 + jnp.dot(rowh, w2b_ref[dy], preferred_element_type=jnp.float32)
        out = bn_relu(acc2, g2_ref[...], be2_ref[...])

        # lane-dense (N*H2, W2*Cout) output slab; NHWC reshape in the wrapper is free.
        o_ref[...] = out

    vmem = pl.BlockSpec(memory_space=pltpu.MemorySpace.VMEM)
    # TODO(synk): for production UNet sizes, add a row-block grid (1-row halo) sized for
    # v7x's 64 MiB VMEM, mark it "parallel" for its 2 TensorCores, switch BatchNorm to a
    # two-pass cross-tile reduction, and replace the banded small-channel weights with a
    # dense im2col matmul (channels padded to the MXU tile).  The whole-image-resident
    # design below is only appropriate at these small shapes.
    out2d = pl.pallas_call(
        kernel,
        out_shape=jax.ShapeDtypeStruct((NH2, LOUT), jnp.float32),
        in_specs=[vmem] * 14,
        out_specs=vmem,
        scratch_shapes=[
            pltpu.VMEM((N, Hp, LC1), jnp.float32),   # padded up(x1)
            pltpu.VMEM((N, Hp, LCO), jnp.float32),   # padded conv1 activation
        ],
    )(x1_rows, x2_rows, wt_ab, bt_lane,
      w1a, w1b, b1l, g1l, be1l,
      w2b, b2l, g2l, be2l, fold_mat)
    return out2d.reshape(N, H2, W2, Cout)


# ----------------------------------------------------------------------------------
# pure-JAX reference (same bf16-operand / f32-accumulate matmul precision)
# ----------------------------------------------------------------------------------
def ref_forward(x1, x2, p):
    f32, bf16 = jnp.float32, jnp.bfloat16
    N, H1, W1, C1 = x1.shape
    wt4 = p["wt"].reshape(C1, 2, 2, C1)
    up = jnp.einsum("nhwc,cabo->nhwabo", x1.astype(bf16), wt4.astype(bf16),
                    preferred_element_type=f32) + p["bt"]
    up = up.transpose(0, 1, 3, 2, 4, 5).reshape(N, 2 * H1, 2 * W1, C1)
    diffY = x2.shape[1] - up.shape[1]
    diffX = x2.shape[2] - up.shape[2]
    up = jnp.pad(up, ((0, 0), (diffY // 2, diffY - diffY // 2),
                      (diffX // 2, diffX - diffX // 2), (0, 0)))
    x = jnp.concatenate([x2, up], axis=-1)

    def conv3x3(x, w, b):
        dn = jax.lax.conv_dimension_numbers(x.shape, w.shape, ("NHWC", "HWIO", "NHWC"))
        y = jax.lax.conv_general_dilated(x.astype(bf16), w.astype(bf16), (1, 1), "SAME",
                                         dimension_numbers=dn,
                                         preferred_element_type=f32)
        return y + b

    def bn_relu(x, g, be):
        mean = x.mean(axis=(0, 1, 2), keepdims=True)
        var = ((x - mean) ** 2).mean(axis=(0, 1, 2), keepdims=True)
        return jnp.maximum(g * (x - mean) * jax.lax.rsqrt(var + EPS) + be, 0.0)

    x = bn_relu(conv3x3(x, p["w1"], p["b1"]), p["g1"], p["be1"])
    x = bn_relu(conv3x3(x, p["w2"], p["b2"]), p["g2"], p["be2"])
    return x


if __name__ == "__main__":
    in_ch, out_ch = 8, 4
    C1 = in_ch // 2                      # channels of x1 and x2
    N, H1, W1 = 2, 8, 8                  # x1 spatial (low-res)
    H2, W2 = 16, 16                      # x2 spatial (high-res)

    key = jax.random.PRNGKey(0)
    ks = jax.random.split(key, 12)

    x1 = jax.random.normal(ks[0], (N, H1, W1, C1), jnp.float32)
    x2 = jax.random.normal(ks[1], (N, H2, W2, C1), jnp.float32)

    params = {
        # ConvTranspose2d(C1, C1, 2, stride=2): weight laid out (ic, a, b, oc) -> (C1, 4*C1)
        "wt": 0.3 * jax.random.normal(ks[2], (C1, 4 * C1), jnp.float32),
        "bt": 0.1 * jax.random.normal(ks[3], (C1,), jnp.float32),
        # conv1: 3x3, in_ch -> out_ch, HWIO layout (input channels = [x2 | up(x1)])
        "w1": 0.2 * jax.random.normal(ks[4], (3, 3, in_ch, out_ch), jnp.float32),
        "b1": 0.1 * jax.random.normal(ks[5], (out_ch,), jnp.float32),
        "g1": 1.0 + 0.1 * jax.random.normal(ks[6], (out_ch,), jnp.float32),
        "be1": 0.1 * jax.random.normal(ks[7], (out_ch,), jnp.float32),
        # conv2: 3x3, out_ch -> out_ch
        "w2": 0.2 * jax.random.normal(ks[8], (3, 3, out_ch, out_ch), jnp.float32),
        "b2": 0.1 * jax.random.normal(ks[9], (out_ch,), jnp.float32),
        "g2": 1.0 + 0.1 * jax.random.normal(ks[10], (out_ch,), jnp.float32),
        "be2": 0.1 * jax.random.normal(ks[11], (out_ch,), jnp.float32),
    }

    out = jax.block_until_ready(jax.jit(up_forward)(x1, x2, params))
    assert out.shape == (N, H2, W2, out_ch), out.shape

    ref = jax.block_until_ready(jax.jit(ref_forward)(x1, x2, params))
    err = float(jnp.max(jnp.abs(out - ref)))
    assert jnp.allclose(out, ref, atol=1e-2, rtol=1e-2), f"max abs err {err}"

    print("KERNEL_OK")
</pallas_src>

<mosaic_0001>
module attributes {stable_mosaic.version = 11 : i64} {
  func.func @kernel(%arg0: memref<16x32xf32, #tpu.memory_space<vmem>>, %arg1: memref<2x18x72xf32, #tpu.memory_space<vmem>>, %arg2: memref<2x32x64xbf16, #tpu.memory_space<vmem>>, %arg3: memref<1x64xf32, #tpu.memory_space<vmem>>, %arg4: memref<3x72x64xbf16, #tpu.memory_space<vmem>>, %arg5: memref<3x72x64xbf16, #tpu.memory_space<vmem>>, %arg6: memref<1x64xf32, #tpu.memory_space<vmem>>, %arg7: memref<1x64xf32, #tpu.memory_space<vmem>>, %arg8: memref<1x64xf32, #tpu.memory_space<vmem>>, %arg9: memref<3x72x64xbf16, #tpu.memory_space<vmem>>, %arg10: memref<1x64xf32, #tpu.memory_space<vmem>>, %arg11: memref<1x64xf32, #tpu.memory_space<vmem>>, %arg12: memref<1x64xf32, #tpu.memory_space<vmem>>, %arg13: memref<64x64xf32, #tpu.memory_space<vmem>>, %arg14: memref<32x64xf32, #tpu.memory_space<vmem>>, %arg15: memref<2x18x72xf32, #tpu.memory_space<vmem>>, %arg16: memref<2x18x72xf32, #tpu.memory_space<vmem>>) attributes {dimension_semantics = [], scalar_prefetch = 0 : i64, scratch_operands = 2 : i64, tpu.core_type = #tpu.core_type<tc>} {
    %cst = arith.constant 0.000000e+00 : f32
    %0 = vector.broadcast %cst : f32 to vector<2x1x72xf32>
    %c0 = arith.constant 0 : index
    %c0_0 = arith.constant 0 : index
    %c0_1 = arith.constant 0 : index
    %1 = vector.load %arg15[%c0, %c0_0, %c0_1] : memref<2x18x72xf32, #tpu.memory_space<vmem>>, vector<2x1x72xf32>
    tpu.vector_store %arg15[%c0, %c0_0, %c0_1], %0 {strides = array<i32>} : memref<2x18x72xf32, #tpu.memory_space<vmem>>, vector<2x1x72xf32>,
    %cst_2 = arith.constant 0.000000e+00 : f32
    %2 = vector.broadcast %cst_2 : f32 to vector<2x1x72xf32>
    %c0_3 = arith.constant 0 : index
    %c17 = arith.constant 17 : index
    %c0_4 = arith.constant 0 : index
    %3 = vector.load %arg15[%c0_3, %c17, %c0_4] : memref<2x18x72xf32, #tpu.memory_space<vmem>>, vector<2x1x72xf32>
    tpu.vector_store %arg15[%c0_3, %c17, %c0_4], %2 {strides = array<i32>} : memref<2x18x72xf32, #tpu.memory_space<vmem>>, vector<2x1x72xf32>,
    %cst_5 = arith.constant 0.000000e+00 : f32
    %4 = vector.broadcast %cst_5 : f32 to vector<2x18x4xf32>
    %c0_6 = arith.constant 0 : index
    %c0_7 = arith.constant 0 : index
    %c0_8 = arith.constant 0 : index
    %5 = vector.load %arg15[%c0_6, %c0_7, %c0_8] : memref<2x18x72xf32, #tpu.memory_space<vmem>>, vector<2x18x4xf32>
    tpu.vector_store %arg15[%c0_6, %c0_7, %c0_8], %4 {strides = array<i32>} : memref<2x18x72xf32, #tpu.memory_space<vmem>>, vector<2x18x4xf32>,
    %cst_9 = arith.constant 0.000000e+00 : f32
    %6 = vector.broadcast %cst_9 : f32 to vector<2x18x4xf32>
    %c0_10 = arith.constant 0 : index
    %c0_11 = arith.constant 0 : index
    %c68 = arith.constant 68 : index
    %7 = vector.load %arg15[%c0_10, %c0_11, %c68] : memref<2x18x72xf32, #tpu.memory_space<vmem>>, vector<2x18x4xf32>
    tpu.vector_store %arg15[%c0_10, %c0_11, %c68], %6 {strides = array<i32>} : memref<2x18x72xf32, #tpu.memory_space<vmem>>, vector<2x18x4xf32>,
    %c0_12 = arith.constant 0 : index
    %c0_13 = arith.constant 0 : index
    %8 = vector.load %arg0[%c0_12, %c0_13] : memref<16x32xf32, #tpu.memory_space<vmem>>, vector<16x32xf32>
    %9 = arith.truncf %8 : vector<16x32xf32> to vector<16x32xbf16>
    %c0_14 = arith.constant 0 : index
    %c0_15 = arith.constant 0 : index
    %c0_16 = arith.constant 0 : index
    %10 = vector.load %arg2[%c0_14, %c0_15, %c0_16] : memref<2x32x64xbf16, #tpu.memory_space<vmem>>, vector<1x32x64xbf16>
    %11 = vector.shape_cast %10 : vector<1x32x64xbf16> to vector<32x64xbf16>
    %cst_17 = arith.constant dense<0.000000e+00> : vector<16x64xf32>
    %12 = tpu.matmul %9, %11, %cst_17 {dimension_numbers = #tpu.dot_dimension_numbers<[1], [0], [0], [1], [0, 0, 1, 1], [], []>} : vector<16x32xbf16>, vector<32x64xbf16>, vector<16x64xf32> -> vector<16x64xf32>
    %c0_18 = arith.constant 0 : index
    %c0_19 = arith.constant 0 : index
    %13 = vector.load %arg3[%c0_18, %c0_19] : memref<1x64xf32, #tpu.memory_space<vmem>>, vector<1x64xf32>
    %14 = vector.broadcast %13 : vector<1x64xf32> to vector<16x64xf32>
    %15 = arith.addf %12, %14 : vector<16x64xf32>
    %16 = vector.shape_cast %15 : vector<16x64xf32> to vector<2x8x64xf32>
    %17 = vector.extract_strided_slice %16 {offsets = [0, 0, 0], sizes = [2, 1, 64], strides = [1, 1, 1]} : vector<2x8x64xf32> to vector<2x1x64xf32>
    %18 = vector.shape_cast %17 : vector<2x1x64xf32> to vector<2x64xf32>
    %c0_20 = arith.constant 0 : index
    %c1 = arith.constant 1 : index
    %c4 = arith.constant 4 : index
    %19 = vector.load %arg15[%c0_20, %c1, %c4] : memref<2x18x72xf32, #tpu.memory_space<vmem>>, vector<2x1x64xf32>
    %20 = vector.shape_cast %19 : vector<2x1x64xf32> to vector<2x64xf32>
    %21 = vector.shape_cast %18 : vector<2x64xf32> to vector<2x1x64xf32>
    tpu.vector_store %arg15[%c0_20, %c1, %c4], %21 {strides = array<i32>} : memref<2x18x72xf32, #tpu.memory_space<vmem>>, vector<2x1x64xf32>,
    %22 = vector.extract_strided_slice %16 {offsets = [0, 1, 0], sizes = [2, 1, 64], strides = [1, 1, 1]} : vector<2x8x64xf32> to vector<2x1x64xf32>
    %23 = vector.shape_cast %22 : vector<2x1x64xf32> to vector<2x64xf32>
    %c0_21 = arith.constant 0 : index
    %c3 = arith.constant 3 : index
    %c4_22 = arith.constant 4 : index
    %24 = vector.load %arg15[%c0_21, %c3, %c4_22] : memref<2x18x72xf32, #tpu.memory_space<vmem>>, vector<2x1x64xf32>
    %25 = vector.shape_cast %24 : vector<2x1x64xf32> to vector<2x64xf32>
    %26 = vector.shape_cast %23 : vector<2x64xf32> to vector<2x1x64xf32>
    tpu.vector_store %arg15[%c0_21, %c3, %c4_22], %26 {strides = array<i32>} : memref<2x18x72xf32, #tpu.memory_space<vmem>>, vector<2x1x64xf32>,
    %27 = vector.extract_strided_slice %16 {offsets = [0, 2, 0], sizes = [2, 1, 64], strides = [1, 1, 1]} : vector<2x8x64xf32> to vector<2x1x64xf32>
    %28 = vector.shape_cast %27 : vector<2x1x64xf32> to vector<2x64xf32>
    %c0_23 = arith.constant 0 : index
    %c5 = arith.constant 5 : index
    %c4_24 = arith.constant 4 : index
    %29 = vector.load %arg15[%c0_23, %c5, %c4_24] : memref<2x18x72xf32, #tpu.memory_space<vmem>>, vector<2x1x64xf32>
    %30 = vector.shape_cast %29 : vector<2x1x64xf32> to vector<2x64xf32>
    %31 = vector.shape_cast %28 : vector<2x64xf32> to vector<2x1x64xf32>
    tpu.vector_store %arg15[%c0_23, %c5, %c4_24], %31 {strides = array<i32>} : memref<2x18x72xf32, #tpu.memory_space<vmem>>, vector<2x1x64xf32>,
    %32 = vector.extract_strided_slice %16 {offsets = [0, 3, 0], sizes = [2, 1, 64], strides = [1, 1, 1]} : vector<2x8x64xf32> to vector<2x1x64xf32>
    %33 = vector.shape_cast %32 : vector<2x1x64xf32> to vector<2x64xf32>
    %c0_25 = arith.constant 0 : index
    %c7 = arith.constant 7 : index
    %c4_26 = arith.constant 4 : index
    %34 = vector.load %arg15[%c0_25, %c7, %c4_26] : memref<2x18x72xf32, #tpu.memory_space<vmem>>, vector<2x1x64xf32>
    %35 = vector.shape_cast %34 : vector<2x1x64xf32> to vector<2x64xf32>
    %36 = vector.shape_cast %33 : vector<2x64xf32> to vector<2x1x64xf32>
    tpu.vector_store %arg15[%c0_25, %c7, %c4_26], %36 {strides = array<i32>} : memref<2x18x72xf32, #tpu.memory_space<vmem>>, vector<2x1x64xf32>,
    %37 = vector.extract_strided_slice %16 {offsets = [0, 4, 0], sizes = [2, 1, 64], strides = [1, 1, 1]} : vector<2x8x64xf32> to vector<2x1x64xf32>
    %38 = vector.shape_cast %37 : vector<2x1x64xf32> to vector<2x64xf32>
    %c0_27 = arith.constant 0 : index
    %c9 = arith.constant 9 : index
    %c4_28 = arith.constant 4 : index
    %39 = vector.load %arg15[%c0_27, %c9, %c4_28] : memref<2x18x72xf32, #tpu.memory_space<vmem>>, vector<2x1x64xf32>
    %40 = vector.shape_cast %39 : vector<2x1x64xf32> to vector<2x64xf32>
    %41 = vector.shape_cast %38 : vector<2x64xf32> to vector<2x1x64xf32>
    tpu.vector_store %arg15[%c0_27, %c9, %c4_28], %41 {strides = array<i32>} : memref<2x18x72xf32, #tpu.memory_space<vmem>>, vector<2x1x64xf32>,
    %42 = vector.extract_strided_slice %16 {offsets = [0, 5, 0], sizes = [2, 1, 64], strides = [1, 1, 1]} : vector<2x8x64xf32> to vector<2x1x64xf32>
    %43 = vector.shape_cast %42 : vector<2x1x64xf32> to vector<2x64xf32>
    %c0_29 = arith.constant 0 : index
    %c11 = arith.constant 11 : index
    %c4_30 = arith.constant 4 : index
    %44 = vector.load %arg15[%c0_29, %c11, %c4_30] : memref<2x18x72xf32, #tpu.memory_space<vmem>>, vector<2x1x64xf32>
    %45 = vector.shape_cast %44 : vector<2x1x64xf32> to vector<2x64xf32>
    %46 = vector.shape_cast %43 : vector<2x64xf32> to vector<2x1x64xf32>
    tpu.vector_store %arg15[%c0_29, %c11, %c4_30], %46 {strides = array<i32>} : memref<2x18x72xf32, #tpu.memory_space<vmem>>, vector<2x1x64xf32>,
    %47 = vector.extract_strided_slice %16 {offsets = [0, 6, 0], sizes = [2, 1, 64], strides = [1, 1, 1]} : vector<2x8x64xf32> to vector<2x1x64xf32>
    %48 = vector.shape_cast %47 : vector<2x1x64xf32> to vector<2x64xf32>
    %c0_31 = arith.constant 0 : index
    %c13 = arith.constant 13 : index
    %c4_32 = arith.constant 4 : index
    %49 = vector.load %arg15[%c0_31, %c13, %c4_32] : memref<2x18x72xf32, #tpu.memory_space<vmem>>, vector<2x1x64xf32>
    %50 = vector.shape_cast %49 : vector<2x1x64xf32> to vector<2x64xf32>
    %51 = vector.shape_cast %48 : vector<2x64xf32> to vector<2x1x64xf32>
    tpu.vector_store %arg15[%c0_31, %c13, %c4_32], %51 {strides = array<i32>} : memref<2x18x72xf32, #tpu.memory_space<vmem>>, vector<2x1x64xf32>,
    %52 = vector.extract_strided_slice %16 {offsets = [0, 7, 0], sizes = [2, 1, 64], strides = [1, 1, 1]} : vector<2x8x64xf32> to vector<2x1x64xf32>
    %53 = vector.shape_cast %52 : vector<2x1x64xf32> to vector<2x64xf32>
    %c0_33 = arith.constant 0 : index
    %c15 = arith.constant 15 : index
    %c4_34 = arith.constant 4 : index
    %54 = vector.load %arg15[%c0_33, %c15, %c4_34] : memref<2x18x72xf32, #tpu.memory_space<vmem>>, vector<2x1x64xf32>
    %55 = vector.shape_cast %54 : vector<2x1x64xf32> to vector<2x64xf32>
    %56 = vector.shape_cast %53 : vector<2x64xf32> to vector<2x1x64xf32>
    tpu.vector_store %arg15[%c0_33, %c15, %c4_34], %56 {strides = array<i32>} : memref<2x18x72xf32, #tpu.memory_space<vmem>>, vector<2x1x64xf32>,
    %c1_35 = arith.constant 1 : index
    %c0_36 = arith.constant 0 : index
    %c0_37 = arith.constant 0 : index
    %57 = vector.load %arg2[%c1_35, %c0_36, %c0_37] : memref<2x32x64xbf16, #tpu.memory_space<vmem>>, vector<1x32x64xbf16>
    %58 = vector.shape_cast %57 : vector<1x32x64xbf16> to vector<32x64xbf16>
    %cst_38 = arith.constant dense<0.000000e+00> : vector<16x64xf32>
    %59 = tpu.matmul %9, %58, %cst_38 {dimension_numbers = #tpu.dot_dimension_numbers<[1], [0], [0], [1], [0, 0, 1, 1], [], []>} : vector<16x32xbf16>, vector<32x64xbf16>, vector<16x64xf32> -> vector<16x64xf32>
    %c0_39 = arith.constant 0 : index
    %c0_40 = arith.constant 0 : index
    %60 = vector.load %arg3[%c0_39, %c0_40] : memref<1x64xf32, #tpu.memory_space<vmem>>, vector<1x64xf32>
    %61 = vector.broadcast %60 : vector<1x64xf32> to vector<16x64xf32>
    %62 = arith.addf %59, %61 : vector<16x64xf32>
    %63 = vector.shape_cast %62 : vector<16x64xf32> to vector<2x8x64xf32>
    %64 = vector.extract_strided_slice %63 {offsets = [0, 0, 0], sizes = [2, 1, 64], strides = [1, 1, 1]} : vector<2x8x64xf32> to vector<2x1x64xf32>
    %65 = vector.shape_cast %64 : vector<2x1x64xf32> to vector<2x64xf32>
    %c0_41 = arith.constant 0 : index
    %c2 = arith.constant 2 : index
    %c4_42 = arith.constant 4 : index
    %66 = vector.load %arg15[%c0_41, %c2, %c4_42] : memref<2x18x72xf32, #tpu.memory_space<vmem>>, vector<2x1x64xf32>
    %67 = vector.shape_cast %66 : vector<2x1x64xf32> to vector<2x64xf32>
    %68 = vector.shape_cast %65 : vector<2x64xf32> to vector<2x1x64xf32>
    tpu.vector_store %arg15[%c0_41, %c2, %c4_42], %68 {strides = array<i32>} : memref<2x18x72xf32, #tpu.memory_space<vmem>>, vector<2x1x64xf32>,
    %69 = vector.extract_strided_slice %63 {offsets = [0, 1, 0], sizes = [2, 1, 64], strides = [1, 1, 1]} : vector<2x8x64xf32> to vector<2x1x64xf32>
    %70 = vector.shape_cast %69 : vector<2x1x64xf32> to vector<2x64xf32>
    %c0_43 = arith.constant 0 : index
    %c4_44 = arith.constant 4 : index
    %c4_45 = arith.constant 4 : index
    %71 = vector.load %arg15[%c0_43, %c4_44, %c4_45] : memref<2x18x72xf32, #tpu.memory_space<vmem>>, vector<2x1x64xf32>
    %72 = vector.shape_cast %71 : vector<2x1x64xf32> to vector<2x64xf32>
    %73 = vector.shape_cast %70 : vector<2x64xf32> to vector<2x1x64xf32>
    tpu.vector_store %arg15[%c0_43, %c4_44, %c4_45], %73 {strides = array<i32>} : memref<2x18x72xf32, #tpu.memory_space<vmem>>, vector<2x1x64xf32>,
    %74 = vector.extract_strided_slice %63 {offsets = [0, 2, 0], sizes = [2, 1, 64], strides = [1, 1, 1]} : vector<2x8x64xf32> to vector<2x1x64xf32>
    %75 = vector.shape_cast %74 : vector<2x1x64xf32> to vector<2x64xf32>
    %c0_46 = arith.constant 0 : index
    %c6 = arith.constant 6 : index
    %c4_47 = arith.constant 4 : index
    %76 = vector.load %arg15[%c0_46, %c6, %c4_47] : memref<2x18x72xf32, #tpu.memory_space<vmem>>, vector<2x1x64xf32>
    %77 = vector.shape_cast %76 : vector<2x1x64xf32> to vector<2x64xf32>
    %78 = vector.shape_cast %75 : vector<2x64xf32> to vector<2x1x64xf32>
    tpu.vector_store %arg15[%c0_46, %c6, %c4_47], %78 {strides = array<i32>} : memref<2x18x72xf32, #tpu.memory_space<vmem>>, vector<2x1x64xf32>,
    %79 = vector.extract_strided_slice %63 {offsets = [0, 3, 0], sizes = [2, 1, 64], strides = [1, 1, 1]} : vector<2x8x64xf32> to vector<2x1x64xf32>
    %80 = vector.shape_cast %79 : vector<2x1x64xf32> to vector<2x64xf32>
    %c0_48 = arith.constant 0 : index
    %c8 = arith.constant 8 : index
    %c4_49 = arith.constant 4 : index
    %81 = vector.load %arg15[%c0_48, %c8, %c4_49] : memref<2x18x72xf32, #tpu.memory_space<vmem>>, vector<2x1x64xf32>
    %82 = vector.shape_cast %81 : vector<2x1x64xf32> to vector<2x64xf32>
    %83 = vector.shape_cast %80 : vector<2x64xf32> to vector<2x1x64xf32>
    tpu.vector_store %arg15[%c0_48, %c8, %c4_49], %83 {strides = array<i32>} : memref<2x18x72xf32, #tpu.memory_space<vmem>>, vector<2x1x64xf32>,
    %84 = vector.extract_strided_slice %63 {offsets = [0, 4, 0], sizes = [2, 1, 64], strides = [1, 1, 1]} : vector<2x8x64xf32> to vector<2x1x64xf32>
    %85 = vector.shape_cast %84 : vector<2x1x64xf32> to vector<2x64xf32>
    %c0_50 = arith.constant 0 : index
    %c10 = arith.constant 10 : index
    %c4_51 = arith.constant 4 : index
    %86 = vector.load %arg15[%c0_50, %c10, %c4_51] : memref<2x18x72xf32, #tpu.memory_space<vmem>>, vector<2x1x64xf32>
    %87 = vector.shape_cast %86 : vector<2x1x64xf32> to vector<2x64xf32>
    %88 = vector.shape_cast %85 : vector<2x64xf32> to vector<2x1x64xf32>
    tpu.vector_store %arg15[%c0_50, %c10, %c4_51], %88 {strides = array<i32>} : memref<2x18x72xf32, #tpu.memory_space<vmem>>, vector<2x1x64xf32>,
    %89 = vector.extract_strided_slice %63 {offsets = [0, 5, 0], sizes = [2, 1, 64], strides = [1, 1, 1]} : vector<2x8x64xf32> to vector<2x1x64xf32>
    %90 = vector.shape_cast %89 : vector<2x1x64xf32> to vector<2x64xf32>
    %c0_52 = arith.constant 0 : index
    %c12 = arith.constant 12 : index
    %c4_53 = arith.constant 4 : index
    %91 = vector.load %arg15[%c0_52, %c12, %c4_53] : memref<2x18x72xf32, #tpu.memory_space<vmem>>, vector<2x1x64xf32>
    %92 = vector.shape_cast %91 : vector<2x1x64xf32> to vector<2x64xf32>
    %93 = vector.shape_cast %90 : vector<2x64xf32> to vector<2x1x64xf32>
    tpu.vector_store %arg15[%c0_52, %c12, %c4_53], %93 {strides = array<i32>} : memref<2x18x72xf32, #tpu.memory_space<vmem>>, vector<2x1x64xf32>,
    %94 = vector.extract_strided_slice %63 {offsets = [0, 6, 0], sizes = [2, 1, 64], strides = [1, 1, 1]} : vector<2x8x64xf32> to vector<2x1x64xf32>
    %95 = vector.shape_cast %94 : vector<2x1x64xf32> to vector<2x64xf32>
    %c0_54 = arith.constant 0 : index
    %c14 = arith.constant 14 : index
    %c4_55 = arith.constant 4 : index
    %96 = vector.load %arg15[%c0_54, %c14, %c4_55] : memref<2x18x72xf32, #tpu.memory_space<vmem>>, vector<2x1x64xf32>
    %97 = vector.shape_cast %96 : vector<2x1x64xf32> to vector<2x64xf32>
    %98 = vector.shape_cast %95 : vector<2x64xf32> to vector<2x1x64xf32>
    tpu.vector_store %arg15[%c0_54, %c14, %c4_55], %98 {strides = array<i32>} : memref<2x18x72xf32, #tpu.memory_space<vmem>>, vector<2x1x64xf32>,
    %99 = vector.extract_strided_slice %63 {offsets = [0, 7, 0], sizes = [2, 1, 64], strides = [1, 1, 1]} : vector<2x8x64xf32> to vector<2x1x64xf32>
    %100 = vector.shape_cast %99 : vector<2x1x64xf32> to vector<2x64xf32>
    %c0_56 = arith.constant 0 : index
    %c16 = arith.constant 16 : index
    %c4_57 = arith.constant 4 : index
    %101 = vector.load %arg15[%c0_56, %c16, %c4_57] : memref<2x18x72xf32, #tpu.memory_space<vmem>>, vector<2x1x64xf32>
    %102 = vector.shape_cast %101 : vector<2x1x64xf32> to vector<2x64xf32>
    %103 = vector.shape_cast %100 : vector<2x64xf32> to vector<2x1x64xf32>
    tpu.vector_store %arg15[%c0_56, %c16, %c4_57], %103 {strides = array<i32>} : memref<2x18x72xf32, #tpu.memory_space<vmem>>, vector<2x1x64xf32>,
    %cst_58 = arith.constant 0.000000e+00 : f32
    %104 = vector.broadcast %cst_58 : f32 to vector<32x64xf32>
    %c0_59 = arith.constant 0 : index
    %c0_60 = arith.constant 0 : index
    %105 = vector.load %arg6[%c0_59, %c0_60] : memref<1x64xf32, #tpu.memory_space<vmem>>, vector<1x64xf32>
    %106 = vector.broadcast %105 : vector<1x64xf32> to vector<32x64xf32>
    %107 = arith.addf %104, %106 : vector<32x64xf32>
    %c0_61 = arith.constant 0 : index
    %c0_62 = arith.constant 0 : index
    %c0_63 = arith.constant 0 : index
    %108 = vector.load %arg1[%c0_61, %c0_62, %c0_63] : memref<2x18x72xf32, #tpu.memory_space<vmem>>, vector<2x16x72xf32>
    %109 = vector.shape_cast %108 : vector<2x16x72xf32> to vector<32x72xf32>
    %110 = arith.truncf %109 : vector<32x72xf32> to vector<32x72xbf16>
    %c0_64 = arith.constant 0 : index
    %c0_65 = arith.constant 0 : index
    %c0_66 = arith.constant 0 : index
    %111 = vector.load %arg15[%c0_64, %c0_65, %c0_66] : memref<2x18x72xf32, #tpu.memory_space<vmem>>, vector<2x16x72xf32>
    %112 = vector.shape_cast %111 : vector<2x16x72xf32> to vector<32x72xf32>
    %113 = arith.truncf %112 : vector<32x72xf32> to vector<32x72xbf16>
    %c0_67 = arith.constant 0 : index
    %c0_68 = arith.constant 0 : index
    %c0_69 = arith.constant 0 : index
    %114 = vector.load %arg4[%c0_67, %c0_68, %c0_69] : memref<3x72x64xbf16, #tpu.memory_space<vmem>>, vector<1x72x64xbf16>
    %115 = vector.shape_cast %114 : vector<1x72x64xbf16> to vector<72x64xbf16>
    %cst_70 = arith.constant dense<0.000000e+00> : vector<32x64xf32>
    %116 = tpu.matmul %110, %115, %cst_70 {dimension_numbers = #tpu.dot_dimension_numbers<[1], [0], [0], [1], [0, 0, 1, 1], [], []>} : vector<32x72xbf16>, vector<72x64xbf16>, vector<32x64xf32> -> vector<32x64xf32>
    %117 = arith.addf %107, %116 : vector<32x64xf32>
    %c0_71 = arith.constant 0 : index
    %c0_72 = arith.constant 0 : index
    %c0_73 = arith.constant 0 : index
    %118 = vector.load %arg5[%c0_71, %c0_72, %c0_73] : memref<3x72x64xbf16, #tpu.memory_space<vmem>>, vector<1x72x64xbf16>
    %119 = vector.shape_cast %118 : vector<1x72x64xbf16> to vector<72x64xbf16>
    %cst_74 = arith.constant dense<0.000000e+00> : vector<32x64xf32>
    %120 = tpu.matmul %113, %119, %cst_74 {dimension_numbers = #tpu.dot_dimension_numbers<[1], [0], [0], [1], [0, 0, 1, 1], [], []>} : vector<32x72xbf16>, vector<72x64xbf16>, vector<32x64xf32> -> vector<32x64xf32>
    %121 = arith.addf %117, %120 : vector<32x64xf32>
    %c0_75 = arith.constant 0 : index
    %c1_76 = arith.constant 1 : index
    %c0_77 = arith.constant 0 : index
    %122 = vector.load %arg1[%c0_75, %c1_76, %c0_77] : memref<2x18x72xf32, #tpu.memory_space<vmem>>, vector<2x16x72xf32>
    %123 = vector.shape_cast %122 : vector<2x16x72xf32> to vector<32x72xf32>
    %124 = arith.truncf %123 : vector<32x72xf32> to vector<32x72xbf16>
    %c0_78 = arith.constant 0 : index
    %c1_79 = arith.constant 1 : index
    %c0_80 = arith.constant 0 : index
    %125 = vector.load %arg15[%c0_78, %c1_79, %c0_80] : memref<2x18x72xf32, #tpu.memory_space<vmem>>, vector<2x16x72xf32>
    %126 = vector.shape_cast %125 : vector<2x16x72xf32> to vector<32x72xf32>
    %127 = arith.truncf %126 : vector<32x72xf32> to vector<32x72xbf16>
    %c1_81 = arith.constant 1 : index
    %c0_82 = arith.constant 0 : index
    %c0_83 = arith.constant 0 : index
    %128 = vector.load %arg4[%c1_81, %c0_82, %c0_83] : memref<3x72x64xbf16, #tpu.memory_space<vmem>>, vector<1x72x64xbf16>
    %129 = vector.shape_cast %128 : vector<1x72x64xbf16> to vector<72x64xbf16>
    %cst_84 = arith.constant dense<0.000000e+00> : vector<32x64xf32>
    %130 = tpu.matmul %124, %129, %cst_84 {dimension_numbers = #tpu.dot_dimension_numbers<[1], [0], [0], [1], [0, 0, 1, 1], [], []>} : vector<32x72xbf16>, vector<72x64xbf16>, vector<32x64xf32> -> vector<32x64xf32>
    %131 = arith.addf %121, %130 : vector<32x64xf32>
    %c1_85 = arith.constant 1 : index
    %c0_86 = arith.constant 0 : index
    %c0_87 = arith.constant 0 : index
    %132 = vector.load %arg5[%c1_85, %c0_86, %c0_87] : memref<3x72x64xbf16, #tpu.memory_space<vmem>>, vector<1x72x64xbf16>
    %133 = vector.shape_cast %132 : vector<1x72x64xbf16> to vector<72x64xbf16>
    %cst_88 = arith.constant dense<0.000000e+00> : vector<32x64xf32>
    %134 = tpu.matmul %127, %133, %cst_88 {dimension_numbers = #tpu.dot_dimension_numbers<[1], [0], [0], [1], [0, 0, 1, 1], [], []>} : vector<32x72xbf16>, vector<72x64xbf16>, vector<32x64xf32> -> vector<32x64xf32>
    %135 = arith.addf %131, %134 : vector<32x64xf32>
    %c0_89 = arith.constant 0 : index
    %c2_90 = arith.constant 2 : index
    %c0_91 = arith.constant 0 : index
    %136 = vector.load %arg1[%c0_89, %c2_90, %c0_91] : memref<2x18x72xf32, #tpu.memory_space<vmem>>, vector<2x16x72xf32>
    %137 = vector.shape_cast %136 : vector<2x16x72xf32> to vector<32x72xf32>
    %138 = arith.truncf %137 : vector<32x72xf32> to vector<32x72xbf16>
    %c0_92 = arith.constant 0 : index
    %c2_93 = arith.constant 2 : index
    %c0_94 = arith.constant 0 : index
    %139 = vector.load %arg15[%c0_92, %c2_93, %c0_94] : memref<2x18x72xf32, #tpu.memory_space<vmem>>, vector<2x16x72xf32>
    %140 = vector.shape_cast %139 : vector<2x16x72xf32> to vector<32x72xf32>
    %141 = arith.truncf %140 : vector<32x72xf32> to vector<32x72xbf16>
    %c2_95 = arith.constant 2 : index
    %c0_96 = arith.constant 0 : index
    %c0_97 = arith.constant 0 : index
    %142 = vector.load %arg4[%c2_95, %c0_96, %c0_97] : memref<3x72x64xbf16, #tpu.memory_space<vmem>>, vector<1x72x64xbf16>
    %143 = vector.shape_cast %142 : vector<1x72x64xbf16> to vector<72x64xbf16>
    %cst_98 = arith.constant dense<0.000000e+00> : vector<32x64xf32>
    %144 = tpu.matmul %138, %143, %cst_98 {dimension_numbers = #tpu.dot_dimension_numbers<[1], [0], [0], [1], [0, 0, 1, 1], [], []>} : vector<32x72xbf16>, vector<72x64xbf16>, vector<32x64xf32> -> vector<32x64xf32>
    %145 = arith.addf %135, %144 : vector<32x64xf32>
    %c2_99 = arith.constant 2 : index
    %c0_100 = arith.constant 0 : index
    %c0_101 = arith.constant 0 : index
    %146 = vector.load %arg5[%c2_99, %c0_100, %c0_101] : memref<3x72x64xbf16, #tpu.memory_space<vmem>>, vector<1x72x64xbf16>
    %147 = vector.shape_cast %146 : vector<1x72x64xbf16> to vector<72x64xbf16>
    %cst_102 = arith.constant dense<0.000000e+00> : vector<32x64xf32>
    %148 = tpu.matmul %141, %147, %cst_102 {dimension_numbers = #tpu.dot_dimension_numbers<[1], [0], [0], [1], [0, 0, 1, 1], [], []>} : vector<32x72xbf16>, vector<72x64xbf16>, vector<32x64xf32> -> vector<32x64xf32>
    %149 = arith.addf %145, %148 : vector<32x64xf32>
    %c0_103 = arith.constant 0 : index
    %c0_104 = arith.constant 0 : index
    %150 = vector.load %arg7[%c0_103, %c0_104] : memref<1x64xf32, #tpu.memory_space<vmem>>, vector<1x64xf32>
    %c0_105 = arith.constant 0 : index
    %c0_106 = arith.constant 0 : index
    %151 = vector.load %arg8[%c0_105, %c0_106] : memref<1x64xf32, #tpu.memory_space<vmem>>, vector<1x64xf32>
    %c0_107 = arith.constant 0 : index
    %c0_108 = arith.constant 0 : index
    %152 = vector.load %arg13[%c0_107, %c0_108] : memref<64x64xf32, #tpu.memory_space<vmem>>, vector<64x64xf32>
    %cst_109 = arith.constant dense<0.000000e+00> : vector<32x64xf32>
    %153 = tpu.matmul %149, %152, %cst_109 {dimension_numbers = #tpu.dot_dimension_numbers<[1], [0], [0], [1], [0, 0, 1, 1], [], []>} : vector<32x64xf32>, vector<64x64xf32>, vector<32x64xf32> -> vector<32x64xf32>
    %cst_110 = arith.constant dense<0.000000e+00> : vector<64xf32>
    %154 = vector.multi_reduction <add>, %153, %cst_110 [0] : vector<32x64xf32> to vector<64xf32>
    %155 = vector.shape_cast %154 : vector<64xf32> to vector<1x64xf32>
    %156 = arith.mulf %149, %149 : vector<32x64xf32>
    %cst_111 = arith.constant dense<0.000000e+00> : vector<32x64xf32>
    %157 = tpu.matmul %156, %152, %cst_111 {dimension_numbers = #tpu.dot_dimension_numbers<[1], [0], [0], [1], [0, 0, 1, 1], [], []>} : vector<32x64xf32>, vector<64x64xf32>, vector<32x64xf32> -> vector<32x64xf32>
    %cst_112 = arith.constant dense<0.000000e+00> : vector<64xf32>
    %158 = vector.multi_reduction <add>, %157, %cst_112 [0] : vector<32x64xf32> to vector<64xf32>
    %159 = vector.shape_cast %158 : vector<64xf32> to vector<1x64xf32>
    %cst_113 = arith.constant 0.001953125 : f32
    %160 = vector.broadcast %cst_113 : f32 to vector<1x64xf32>
    %161 = arith.mulf %155, %160 : vector<1x64xf32>
    %cst_114 = arith.constant 0.001953125 : f32
    %162 = vector.broadcast %cst_114 : f32 to vector<1x64xf32>
    %163 = arith.mulf %159, %162 : vector<1x64xf32>
    %164 = arith.mulf %161, %161 : vector<1x64xf32>
    %165 = arith.subf %163, %164 : vector<1x64xf32>
    %cst_115 = arith.constant 0.000000e+00 : f32
    %166 = vector.broadcast %cst_115 : f32 to vector<1x64xf32>
    %167 = arith.maximumf %165, %166 : vector<1x64xf32>
    %cst_116 = arith.constant 9.99999974E-6 : f32
    %168 = vector.broadcast %cst_116 : f32 to vector<1x64xf32>
    %169 = arith.addf %167, %168 : vector<1x64xf32>
    %170 = math.rsqrt %169 : vector<1x64xf32>
    %171 = arith.mulf %150, %170 : vector<1x64xf32>
    %172 = vector.broadcast %171 : vector<1x64xf32> to vector<32x64xf32>
    %173 = arith.mulf %149, %172 : vector<32x64xf32>
    %174 = arith.mulf %161, %171 : vector<1x64xf32>
    %175 = arith.subf %151, %174 : vector<1x64xf32>
    %176 = vector.broadcast %175 : vector<1x64xf32> to vector<32x64xf32>
    %177 = arith.addf %173, %176 : vector<32x64xf32>
    %cst_117 = arith.constant 0.000000e+00 : f32
    %178 = vector.broadcast %cst_117 : f32 to vector<32x64xf32>
    %179 = arith.maximumf %177, %178 : vector<32x64xf32>
    %cst_118 = arith.constant 0.000000e+00 : f32
    %180 = vector.broadcast %cst_118 : f32 to vector<2x1x72xf32>
    %c0_119 = arith.constant 0 : index
    %c0_120 = arith.constant 0 : index
    %c0_121 = arith.constant 0 : index
    %181 = vector.load %arg16[%c0_119, %c0_120, %c0_121] : memref<2x18x72xf32, #tpu.memory_space<vmem>>, vector<2x1x72xf32>
    tpu.vector_store %arg16[%c0_119, %c0_120, %c0_121], %180 {strides = array<i32>} : memref<2x18x72xf32, #tpu.memory_space<vmem>>, vector<2x1x72xf32>,
    %cst_122 = arith.constant 0.000000e+00 : f32
    %182 = vector.broadcast %cst_122 : f32 to vector<2x1x72xf32>
    %c0_123 = arith.constant 0 : index
    %c17_124 = arith.constant 17 : index
    %c0_125 = arith.constant 0 : index
    %183 = vector.load %arg16[%c0_123, %c17_124, %c0_125] : memref<2x18x72xf32, #tpu.memory_space<vmem>>, vector<2x1x72xf32>
    tpu.vector_store %arg16[%c0_123, %c17_124, %c0_125], %182 {strides = array<i32>} : memref<2x18x72xf32, #tpu.memory_space<vmem>>, vector<2x1x72xf32>,
    %cst_126 = arith.constant 0.000000e+00 : f32
    %184 = vector.broadcast %cst_126 : f32 to vector<2x18x4xf32>
    %c0_127 = arith.constant 0 : index
    %c0_128 = arith.constant 0 : index
    %c0_129 = arith.constant 0 : index
    %185 = vector.load %arg16[%c0_127, %c0_128, %c0_129] : memref<2x18x72xf32, #tpu.memory_space<vmem>>, vector<2x18x4xf32>
    tpu.vector_store %arg16[%c0_127, %c0_128, %c0_129], %184 {strides = array<i32>} : memref<2x18x72xf32, #tpu.memory_space<vmem>>, vector<2x18x4xf32>,
    %cst_130 = arith.constant 0.000000e+00 : f32
    %186 = vector.broadcast %cst_130 : f32 to vector<2x18x4xf32>
    %c0_131 = arith.constant 0 : index
    %c0_132 = arith.constant 0 : index
    %c68_133 = arith.constant 68 : index
    %187 = vector.load %arg16[%c0_131, %c0_132, %c68_133] : memref<2x18x72xf32, #tpu.memory_space<vmem>>, vector<2x18x4xf32>
    tpu.vector_store %arg16[%c0_131, %c0_132, %c68_133], %186 {strides = array<i32>} : memref<2x18x72xf32, #tpu.memory_space<vmem>>, vector<2x18x4xf32>,
    %188 = vector.shape_cast %179 : vector<32x64xf32> to vector<2x16x64xf32>
    %c0_134 = arith.constant 0 : index
    %c1_135 = arith.constant 1 : index
    %c4_136 = arith.constant 4 : index
    %189 = vector.load %arg16[%c0_134, %c1_135, %c4_136] : memref<2x18x72xf32, #tpu.memory_space<vmem>>, vector<2x16x64xf32>
    tpu.vector_store %arg16[%c0_134, %c1_135, %c4_136], %188 {strides = array<i32>} : memref<2x18x72xf32, #tpu.memory_space<vmem>>, vector<2x16x64xf32>,
    %cst_137 = arith.constant 0.000000e+00 : f32
    %190 = vector.broadcast %cst_137 : f32 to vector<32x64xf32>
    %c0_138 = arith.constant 0 : index
    %c0_139 = arith.constant 0 : index
    %191 = vector.load %arg10[%c0_138, %c0_139] : memref<1x64xf32, #tpu.memory_space<vmem>>, vector<1x64xf32>
    %192 = vector.broadcast %191 : vector<1x64xf32> to vector<32x64xf32>
    %193 = arith.addf %190, %192 : vector<32x64xf32>
    %c0_140 = arith.constant 0 : index
    %c0_141 = arith.constant 0 : index
    %c0_142 = arith.constant 0 : index
    %194 = vector.load %arg16[%c0_140, %c0_141, %c0_142] : memref<2x18x72xf32, #tpu.memory_space<vmem>>, vector<2x16x72xf32>
    %195 = vector.shape_cast %194 : vector<2x16x72xf32> to vector<32x72xf32>
    %196 = arith.truncf %195 : vector<32x72xf32> to vector<32x72xbf16>
    %c0_143 = arith.constant 0 : index
    %c0_144 = arith.constant 0 : index
    %c0_145 = arith.constant 0 : index
    %197 = vector.load %arg9[%c0_143, %c0_144, %c0_145] : memref<3x72x64xbf16, #tpu.memory_space<vmem>>, vector<1x72x64xbf16>
    %198 = vector.shape_cast %197 : vector<1x72x64xbf16> to vector<72x64xbf16>
    %cst_146 = arith.constant dense<0.000000e+00> : vector<32x64xf32>
    %199 = tpu.matmul %196, %198, %cst_146 {dimension_numbers = #tpu.dot_dimension_numbers<[1], [0], [0], [1], [0, 0, 1, 1], [], []>} : vector<32x72xbf16>, vector<72x64xbf16>, vector<32x64xf32> -> vector<32x64xf32>
    %200 = arith.addf %193, %199 : vector<32x64xf32>
    %c0_147 = arith.constant 0 : index
    %c1_148 = arith.constant 1 : index
    %c0_149 = arith.constant 0 : index
    %201 = vector.load %arg16[%c0_147, %c1_148, %c0_149] : memref<2x18x72xf32, #tpu.memory_space<vmem>>, vector<2x16x72xf32>
    %202 = vector.shape_cast %201 : vector<2x16x72xf32> to vector<32x72xf32>
    %203 = arith.truncf %202 : vector<32x72xf32> to vector<32x72xbf16>
    %c1_150 = arith.constant 1 : index
    %c0_151 = arith.constant 0 : index
    %c0_152 = arith.constant 0 : index
    %204 = vector.load %arg9[%c1_150, %c0_151, %c0_152] : memref<3x72x64xbf16, #tpu.memory_space<vmem>>, vector<1x72x64xbf16>
    %205 = vector.shape_cast %204 : vector<1x72x64xbf16> to vector<72x64xbf16>
    %cst_153 = arith.constant dense<0.000000e+00> : vector<32x64xf32>
    %206 = tpu.matmul %203, %205, %cst_153 {dimension_numbers = #tpu.dot_dimension_numbers<[1], [0], [0], [1], [0, 0, 1, 1], [], []>} : vector<32x72xbf16>, vector<72x64xbf16>, vector<32x64xf32> -> vector<32x64xf32>
    %207 = arith.addf %200, %206 : vector<32x64xf32>
    %c0_154 = arith.constant 0 : index
    %c2_155 = arith.constant 2 : index
    %c0_156 = arith.constant 0 : index
    %208 = vector.load %arg16[%c0_154, %c2_155, %c0_156] : memref<2x18x72xf32, #tpu.memory_space<vmem>>, vector<2x16x72xf32>
    %209 = vector.shape_cast %208 : vector<2x16x72xf32> to vector<32x72xf32>
    %210 = arith.truncf %209 : vector<32x72xf32> to vector<32x72xbf16>
    %c2_157 = arith.constant 2 : index
    %c0_158 = arith.constant 0 : index
    %c0_159 = arith.constant 0 : index
    %211 = vector.load %arg9[%c2_157, %c0_158, %c0_159] : memref<3x72x64xbf16, #tpu.memory_space<vmem>>, vector<1x72x64xbf16>
    %212 = vector.shape_cast %211 : vector<1x72x64xbf16> to vector<72x64xbf16>
    %cst_160 = arith.constant dense<0.000000e+00> : vector<32x64xf32>
    %213 = tpu.matmul %210, %212, %cst_160 {dimension_numbers = #tpu.dot_dimension_numbers<[1], [0], [0], [1], [0, 0, 1, 1], [], []>} : vector<32x72xbf16>, vector<72x64xbf16>, vector<32x64xf32> -> vector<32x64xf32>
    %214 = arith.addf %207, %213 : vector<32x64xf32>
    %c0_161 = arith.constant 0 : index
    %c0_162 = arith.constant 0 : index
    %215 = vector.load %arg11[%c0_161, %c0_162] : memref<1x64xf32, #tpu.memory_space<vmem>>, vector<1x64xf32>
    %c0_163 = arith.constant 0 : index
    %c0_164 = arith.constant 0 : index
    %216 = vector.load %arg12[%c0_163, %c0_164] : memref<1x64xf32, #tpu.memory_space<vmem>>, vector<1x64xf32>
    %c0_165 = arith.constant 0 : index
    %c0_166 = arith.constant 0 : index
    %217 = vector.load %arg13[%c0_165, %c0_166] : memref<64x64xf32, #tpu.memory_space<vmem>>, vector<64x64xf32>
    %cst_167 = arith.constant dense<0.000000e+00> : vector<32x64xf32>
    %218 = tpu.matmul %214, %217, %cst_167 {dimension_numbers = #tpu.dot_dimension_numbers<[1], [0], [0], [1], [0, 0, 1, 1], [], []>} : vector<32x64xf32>, vector<64x64xf32>, vector<32x64xf32> -> vector<32x64xf32>
    %cst_168 = arith.constant dense<0.000000e+00> : vector<64xf32>
    %219 = vector.multi_reduction <add>, %218, %cst_168 [0] : vector<32x64xf32> to vector<64xf32>
    %220 = vector.shape_cast %219 : vector<64xf32> to vector<1x64xf32>
    %221 = arith.mulf %214, %214 : vector<32x64xf32>
    %cst_169 = arith.constant dense<0.000000e+00> : vector<32x64xf32>
    %222 = tpu.matmul %221, %217, %cst_169 {dimension_numbers = #tpu.dot_dimension_numbers<[1], [0], [0], [1], [0, 0, 1, 1], [], []>} : vector<32x64xf32>, vector<64x64xf32>, vector<32x64xf32> -> vector<32x64xf32>
    %cst_170 = arith.constant dense<0.000000e+00> : vector<64xf32>
    %223 = vector.multi_reduction <add>, %222, %cst_170 [0] : vector<32x64xf32> to vector<64xf32>
    %224 = vector.shape_cast %223 : vector<64xf32> to vector<1x64xf32>
    %cst_171 = arith.constant 0.001953125 : f32
    %225 = vector.broadcast %cst_171 : f32 to vector<1x64xf32>
    %226 = arith.mulf %220, %225 : vector<1x64xf32>
    %cst_172 = arith.constant 0.001953125 : f32
    %227 = vector.broadcast %cst_172 : f32 to vector<1x64xf32>
    %228 = arith.mulf %224, %227 : vector<1x64xf32>
    %229 = arith.mulf %226, %226 : vector<1x64xf32>
    %230 = arith.subf %228, %229 : vector<1x64xf32>
    %cst_173 = arith.constant 0.000000e+00 : f32
    %231 = vector.broadcast %cst_173 : f32 to vector<1x64xf32>
    %232 = arith.maximumf %230, %231 : vector<1x64xf32>
    %cst_174 = arith.constant 9.99999974E-6 : f32
    %233 = vector.broadcast %cst_174 : f32 to vector<1x64xf32>
    %234 = arith.addf %232, %233 : vector<1x64xf32>
    %235 = math.rsqrt %234 : vector<1x64xf32>
    %236 = arith.mulf %215, %235 : vector<1x64xf32>
    %237 = vector.broadcast %236 : vector<1x64xf32> to vector<32x64xf32>
    %238 = arith.mulf %214, %237 : vector<32x64xf32>
    %239 = arith.mulf %226, %236 : vector<1x64xf32>
    %240 = arith.subf %216, %239 : vector<1x64xf32>
    %241 = vector.broadcast %240 : vector<1x64xf32> to vector<32x64xf32>
    %242 = arith.addf %238, %241 : vector<32x64xf32>
    %cst_175 = arith.constant 0.000000e+00 : f32
    %243 = vector.broadcast %cst_175 : f32 to vector<32x64xf32>
    %244 = arith.maximumf %242, %243 : vector<32x64xf32>
    %c0_176 = arith.constant 0 : index
    %c0_177 = arith.constant 0 : index
    %245 = vector.load %arg14[%c0_176, %c0_177] : memref<32x64xf32, #tpu.memory_space<vmem>>, vector<32x64xf32>
    tpu.vector_store %arg14[%c0_176, %c0_177], %244 {strides = array<i32>} : memref<32x64xf32, #tpu.memory_space<vmem>>, vector<32x64xf32>,
    return
  }
}

</mosaic_0001>

<bundles_post_ra>
// kernel: mul.18
= control target key start
LH: loop header
LB: loop body
LE: loop exit
PB: predicated region body
PF: predicated region fallthrough
CT: control target
= control target key end

     0   :  { %vm21_vm0 = vcmask 31744   ;;  %vm27_vm1 = vcmask 64544   ;;  %s67_s0 = inlined_call_operand.vmem [shape: f32[4,1,2,4], index: 0, kind: input, shape index: {}]   ;;  %s68_s1 = inlined_call_operand.vmem [shape: f32[4,8], index: 1, kind: output, shape index: {}]  }
   0x1   :  { %v37_v0 = vld [vmem:[%s67_s0 + $0x6] sm:$0x3]  ;;  %v38_v1 = vld [vmem:[%s67_s0 + $0x4] sm:$0x3]  ;;  %v39_v2 = vld [vmem:[%s67_s0 + $0x2] sm:$0x3] }
   0x2   :  { %8 = vst [vmem:[#allocation1 + $0x18] sm:$0x3] %v37_v0  ;;  %13 = vst [vmem:[#allocation1 + $0x10] sm:$0x3] %v38_v1  ;;  %v18_v3 = vld [vmem:[%s67_s0] sm:$0x3] }
   0x3   :  { %17 = vst [vmem:[#allocation1 + $0x8] sm:$0x3] %v39_v2  ;;  %19 = vst [vmem:[#allocation1] sm:$0x3] %v18_v3  ;;  %s41_s0 = smov 4  }
   0xa   :  { %v24_v4 = vld [vmem:[#allocation1 + $0x1] ss:$8 sm:$0xf]   ;;  %v20_v5 = vld [vmem:[#allocation1] ss:$8 sm:$0xf]  }
   0xb   :  { %25 = vrot.lane.b32.xlu0 %v24_v4, %s41_s0  ;;  %22 = vst.msk [vmem:[#allocation0] sm:$0xf] %vm21_vm0, %v20_v5  }
  0x7d   :  { %v26_v6 = vpop.permute.xlu0 %25  }
  0x7e   :  { %28 = vst.msk [vmem:[#allocation0] sm:$0xf] %vm27_vm1, %v26_v6  }
  0x85   :  { %v32_v7 = vld [vmem:[#allocation0] sm:$0xf] }
  0x86   :  { %34 = vst [vmem:[%s68_s1] sm:$0xf] %v32_v7 }

// kernel: tile.38
= control target key start
LH: loop header
LB: loop body
LE: loop exit
PB: predicated region body
PF: predicated region fallthrough
CT: control target
= control target key end

     0   :  { %s28_s0 = inlined_call_operand.vmem [shape: f32[4], index: 0, kind: input, shape index: {}]   ;;  %s29_s1 = inlined_call_operand.vmem [shape: f32[16,4], index: 1, kind: output, shape index: {}]  }
   0x1   :  { %v4_v0 = vld [vmem:[%s28_s0] ss:$0 sm:$0xff] }
   0x2   :  { %5 = vst [vmem:[%s29_s1] sm:$0xff] %v4_v0  ;;  %8 = vst [vmem:[%s29_s1 + $0x8] sm:$0xff] %v4_v0 }

// kernel: tile.39
= control target key start
LH: loop header
LB: loop body
LE: loop exit
PB: predicated region body
PF: predicated region fallthrough
CT: control target
= control target key end

     0   :  { %s131_s10 = smov 60   ;;  %s132_s11 = smov 52   ;;  %vm3_vm0 = vcmask 31744   ;;  %vm9_vm1 = vcmask 523744   ;;  %vm15_vm2 = vcmask 490944   ;;  %vm21_vm3 = vcmask 458144   ;;  %s207_s0 = inlined_call_operand.vmem [shape: f32[16,4], index: 0, kind: input, shape index: {}]   ;;  %s208_s1 = inlined_call_operand.vmem [shape: f32[1,64], index: 1, kind: output, shape index: {}]  }
   0x1   :  { %v101_v0 = vld [vmem:[%s207_s0 + $0xf] sm:$0x1]   ;;  %v103_v1 = vld [vmem:[%s207_s0 + $0xd] sm:$0x1]   ;;  %v102_v2 = vld [vmem:[%s207_s0 + $0xe] sm:$0x1]  }
   0x2   :  { %7 = vrot.lane.b32.xlu0 %v101_v0, %s131_s10  ;;  %19 = vrot.lane.b32.xlu1 %v103_v1, %s132_s11  ;;  %v104_v3 = vld [vmem:[%s207_s0 + $0xc] sm:$0x1]   ;;  %s133_s16 = smov 56   ;;  %s134_s17 = smov 48   ;;  %v105_v4 = vld [vmem:[%s207_s0 + $0xb] sm:$0x1]  }
   0x3   :  { %v106_v5 = vld [vmem:[%s207_s0 + $0xa] sm:$0x1]   ;;  %v2_v6 = vld [vmem:[%s207_s0] sm:$0x1]   ;;  %s135_s24 = smov 44   ;;  %s136_s25 = smov 40  }
   0x4   :  { %4 = vst.msk [vmem:[#allocation0] sm:$0x1] %vm3_vm0, %v2_v6   ;;  %v107_v7 = vld [vmem:[%s207_s0 + $0x9] sm:$0x1]   ;;  %v108_v8 = vld [vmem:[%s207_s0 + $0x8] sm:$0x1]  }
   0x5   :  { %s137_s30 = smov 36   ;;  %s138_s2 = smov 32   ;;  %v109_v9 = vld [vmem:[%s207_s0 + $0x7] sm:$0x1]   ;;  %v110_v10 = vld [vmem:[%s207_s0 + $0x6] sm:$0x1]  }
   0x6   :  { %13 = vrot.lane.b32.xlu0 %v102_v2, %s133_s16  ;;  %25 = vrot.lane.b32.xlu1 %v104_v3, %s134_s17  ;;  %s139_s7 = smov 28   ;;  %s140_s8 = smov 24   ;;  %v111_v11 = vld [vmem:[%s207_s0 + $0x5] sm:$0x1]   ;;  %v112_v12 = vld [vmem:[%s207_s0 + $0x4] sm:$0x1]  }
   0x7   :  { %s141_s13 = smov 20   ;;  %s142_s14 = smov 16   ;;  %v113_v13 = vld [vmem:[%s207_s0 + $0x3] sm:$0x1]   ;;  %v114_v14 = vld [vmem:[%s207_s0 + $0x2] sm:$0x1]  }
   0x8   :  { %s143_s19 = smov 12   ;;  %s144_s20 = smov 8   ;;  %v115_v15 = vld [vmem:[%s207_s0 + $0x1] sm:$0x1]   ;;  %vm27_vm4 = vcmask 425344   ;;  %vm33_vm5 = vcmask 392544  }
   0x9   :  { %s145_s0 = smov 4   ;;  %vm39_vm6 = vcmask 359744   ;;  %vm45_vm7 = vcmask 326944   ;;  %vm51_vm8 = vcmask 294144   ;;  %vm57_vm9 = vcmask 261344  }
   0xa   :  { %31 = vrot.lane.b32.xlu0 %v105_v4, %s135_s24  ;;  %37 = vrot.lane.b32.xlu1 %v106_v5, %s136_s25  ;;  %vm63_vm10 = vcmask 228544   ;;  %vm69_vm11 = vcmask 195744   ;;  %vm75_vm12 = vcmask 162944   ;;  %vm81_vm13 = vcmask 130144  }
   0xb   :  { %vm87_vm14 = vcmask 97344   ;;  %vm93_vm15 = vcmask 64544  }
   0xe   :  { %43 = vrot.lane.b32.xlu0 %v107_v7, %s137_s30  ;;  %49 = vrot.lane.b32.xlu1 %v108_v8, %s138_s2 }
  0x12   :  { %55 = vrot.lane.b32.xlu0 %v109_v9, %s139_s7  ;;  %61 = vrot.lane.b32.xlu1 %v110_v10, %s140_s8 }
  0x16   :  { %67 = vrot.lane.b32.xlu0 %v111_v11, %s141_s13  ;;  %73 = vrot.lane.b32.xlu1 %v112_v12, %s142_s14 }
  0x1a   :  { %79 = vrot.lane.b32.xlu0 %v113_v13, %s143_s19  ;;  %85 = vrot.lane.b32.xlu1 %v114_v14, %s144_s20 }
  0x1e   :  { %91 = vrot.lane.b32.xlu0 %v115_v15, %s145_s0 }
  0x74   :  { %v8_v16 = vpop.permute.xlu0 %7   ;;  %v20_v17 = vpop.permute.xlu1 %19  }
  0x75   :  { %10 = vst.msk [vmem:[#allocation0] sm:$0x1] %vm9_vm1, %v8_v16  }
  0x78   :  { %v14_v18 = vpop.permute.xlu0 %13   ;;  %v26_v19 = vpop.permute.xlu1 %25  }
  0x79   :  { %16 = vst.msk [vmem:[#allocation0] sm:$0x1] %vm15_vm2, %v14_v18  }
  0x7a   :  { %22 = vst.msk [vmem:[#allocation0] sm:$0x1] %vm21_vm3, %v20_v17  }
  0x7b   :  { %28 = vst.msk [vmem:[#allocation0] sm:$0x1] %vm27_vm4, %v26_v19  }
  0x7c   :  { %v32_v20 = vpop.permute.xlu0 %31   ;;  %v38_v21 = vpop.permute.xlu1 %37  }
  0x7d   :  { %34 = vst.msk [vmem:[#allocation0] sm:$0x1] %vm33_vm5, %v32_v20  }
  0x7e   :  { %40 = vst.msk [vmem:[#allocation0] sm:$0x1] %vm39_vm6, %v38_v21  }
  0x80   :  { %v44_v22 = vpop.permute.xlu0 %43   ;;  %v50_v23 = vpop.permute.xlu1 %49  }
  0x81   :  { %46 = vst.msk [vmem:[#allocation0] sm:$0x1] %vm45_vm7, %v44_v22  }
  0x82   :  { %52 = vst.msk [vmem:[#allocation0] sm:$0x1] %vm51_vm8, %v50_v23  }
  0x84   :  { %v56_v24 = vpop.permute.xlu0 %55   ;;  %v62_v25 = vpop.permute.xlu1 %61  }
  0x85   :  { %58 = vst.msk [vmem:[#allocation0] sm:$0x1] %vm57_vm9, %v56_v24  }
  0x86   :  { %64 = vst.msk [vmem:[#allocation0] sm:$0x1] %vm63_vm10, %v62_v25  }
  0x88   :  { %v68_v26 = vpop.permute.xlu0 %67   ;;  %v74_v27 = vpop.permute.xlu1 %73  }
  0x89   :  { %70 = vst.msk [vmem:[#allocation0] sm:$0x1] %vm69_vm11, %v68_v26  }
  0x8a   :  { %76 = vst.msk [vmem:[#allocation0] sm:$0x1] %vm75_vm12, %v74_v27  }
  0x8c   :  { %v80_v28 = vpop.permute.xlu0 %79   ;;  %v86_v29 = vpop.permute.xlu1 %85  }
  0x8d   :  { %82 = vst.msk [vmem:[#allocation0] sm:$0x1] %vm81_vm13, %v80_v28  }
  0x8e   :  { %88 = vst.msk [vmem:[#allocation0] sm:$0x1] %vm87_vm14, %v86_v29  }
  0x90   :  { %v92_v30 = vpop.permute.xlu0 %91  }
  0x91   :  { %94 = vst.msk [vmem:[#allocation0] sm:$0x1] %vm93_vm15, %v92_v30  }
  0x98   :  { %v98_v31 = vld [vmem:[#allocation0] sm:$0x1] }
  0x99   :  { %100 = vst [vmem:[%s208_s1] sm:$0x1] %v98_v31 }

// kernel: up_forward.1
= control target key start
LH: loop header
LB: loop body
LE: loop exit
PB: predicated region body
PF: predicated region fallthrough
CT: control target
= control target key end

     0   :  { %v2462_v0 = vmov 0.0   ;;  %vm2463_vm0 = vmmov 0   ;;  %vm95_vm1 = vcmask 261120   ;;  %vm48_vm2 = vcmask 581632   ;;  %s2464_s19 = smov 4   ;;  %s3050_s2 = inlined_call_operand.vmem [shape: bf16[2,32,64], index: 2, kind: input, shape index: {}]   ;;  %s3051_s0 = inlined_call_operand.vmem [shape: f32[16,32], index: 0, kind: input, shape index: {}]   ;;  %s3052_s4 = inlined_call_operand.vmem [shape: bf16[3,72,64], index: 4, kind: input, shape index: {}]   ;;  %s3053_s1 = inlined_call_operand.vmem [shape: f32[2,18,72], index: 1, kind: input, shape index: {}]   ;;  %s3054_s5 = inlined_call_operand.vmem [shape: bf16[3,72,64], index: 5, kind: input, shape index: {}]   ;;  %s3055_s3 = inlined_call_operand.vmem [shape: f32[1,64], index: 3, kind: input, shape index: {}]   ;;  %s3056_s13 = inlined_call_operand.vmem [shape: f32[64,64], index: 13, kind: input, shape index: {}]   ;;  %s3057_s6 = inlined_call_operand.vmem [shape: f32[1,64], index: 6, kind: input, shape index: {}]   ;;  %s3058_s9 = inlined_call_operand.vmem [shape: bf16[3,72,64], index: 9, kind: input, shape index: {}]   ;;  %s3059_s7 = inlined_call_operand.vmem [shape: f32[1,64], index: 7, kind: input, shape index: {}]   ;;  %s3060_s8 = inlined_call_operand.vmem [shape: f32[1,64], index: 8, kind: input, shape index: {}]   ;;  %s3061_s10 = inlined_call_operand.vmem [shape: f32[1,64], index: 10, kind: input, shape index: {}]   ;;  %s3062_s11 = inlined_call_operand.vmem [shape: f32[1,64], index: 11, kind: input, shape index: {}]   ;;  %s3063_s12 = inlined_call_operand.vmem [shape: f32[1,64], index: 12, kind: input, shape index: {}]   ;;  %s3064_s14 = inlined_call_operand.vmem [shape: f32[32,64], index: 14, kind: output, shape index: {}]  }
   0x1   :  { %2067 = vmatprep.subr.bf16.mxu0 %v2462_v0  ;;  %v2409_v1 = vld [vmem:[%s3050_s2] sm:$0xff]   ;;  %2075 = vmatprep.subr.bf16.mxu1 %v2462_v0  ;;  %v2410_v2 = vld [vmem:[%s3050_s2 + $0x10] sm:$0xff]   ;;  %v2411_v3 = vld [vmem:[%s3050_s2 + $0x8] sm:$0xff]   ;;  %vm53_vm3 = vcmask 31744   ;;  %49 = vst.msk [vmem:[#allocation2] sm:$0x1] %vm48_vm2, %v2462_v0 }
   0x2   :  { %2071 = vmatprep.mubr.msk.bf16.mxu0 %vm2463_vm0, %v2462_v0  ;;  %2079 = vmatprep.mubr.msk.bf16.mxu1 %vm2463_vm0, %v2462_v0  ;;  %v2412_v4 = vld [vmem:[%s3050_s2 + $0x18] sm:$0xff]   ;;  %v69_v5 = vld [vmem:[%s3051_s0] sm:$0xff]  ;;  %v70_v6 = vld [vmem:[%s3051_s0 + $0x8] sm:$0xff]  ;;  %55 = vst.msk [vmem:[#allocation2 + $0x8] sm:$0xff] %vm53_vm3, %v2462_v0  ;;  %vm61_vm4 = vcmask 589344   ;;  %vm324_vm5 = vcmask 1043456  }
   0x3   :  { %2068 = vmatpush3.bf16.msra.mxu0 %v2409_v1  ;;  %2076 = vmatpush3.bf16.msra.mxu1 %v2410_v2  ;;  %v71_v7 = vpack.c.bf16 %v70_v6, %v69_v5  ;;  %v2413_v8 = vld [vmem:[%s3052_s4] sm:$0xff]   ;;  %50 = vst.msk [vmem:[#allocation2 + $0x18] sm:$0x1] %vm48_vm2, %v2462_v0  ;;  %51 = vst.msk [vmem:[#allocation2 + $0x11] sm:$0x1] %vm48_vm2, %v2462_v0  ;;  %v2414_v9 = vld [vmem:[%s3052_s4 + $0x8] sm:$0xff]  }
   0x4   :  { %2069 = vmatprep.subr.bf16.mxu0 %v2462_v0  ;;  %2077 = vmatprep.subr.bf16.mxu1 %v2462_v0  ;;  %52 = vst.msk [vmem:[#allocation2 + $0x29] sm:$0x1] %vm48_vm2, %v2462_v0  ;;  %1168 = vst.msk [vmem:[#allocation3] sm:$0x1] %vm48_vm2, %v2462_v0  ;;  %v2415_v10 = vld [vmem:[%s3052_s4 + $0x10] sm:$0xff]   ;;  %v269_v12 = vld [vmem:[%s3053_s1] sm:$0xff] }
   0x5   :  { %59 = vst.msk [vmem:[#allocation2 + $0x20] sm:$0xff] %vm53_vm3, %v2462_v0  ;;  %1173 = vst.msk [vmem:[#allocation3 + $0x8] sm:$0xff] %vm53_vm3, %v2462_v0  ;;  %v2417_v11 = vld [vmem:[%s3052_s4 + $0x20] ss:$0 sps:$4 sm:$0xff]   ;;  %v270_v13 = vld [vmem:[%s3053_s1 + $0x8] sm:$0xff]  ;;  %vm317_vm6 = vcmask 588800  }
   0x6   :  { %1169 = vst.msk [vmem:[#allocation3 + $0x18] sm:$0x1] %vm48_vm2, %v2462_v0  ;;  %1170 = vst.msk [vmem:[#allocation3 + $0x11] sm:$0x1] %vm48_vm2, %v2462_v0  ;;  %v273_v14 = vpack.c.bf16 %v270_v13, %v269_v12  ;;  %v2416_v15 = vld [vmem:[%s3052_s4 + $0x18] sm:$0xff]   ;;  %v326_v16 = vsel %vm324_vm5, %v2417_v11, 0 }
   0x7   :  { %2070 = vmatpush3.bf16.msra.mxu0 %v2411_v3  ;;  %2078 = vmatpush3.bf16.msra.mxu1 %v2412_v4  ;;  %1171 = vst.msk [vmem:[#allocation3 + $0x29] sm:$0x1] %vm48_vm2, %v2462_v0  ;;  %v271_v17 = vld [vmem:[%s3053_s1 + $0x18] sm:$0xff]  ;;  %v272_v18 = vld [vmem:[%s3053_s1 + $0x20] sm:$0xff]  ;;  %v2419_v21 = vld [vmem:[%s3054_s5 + $0x8] sm:$0xff]   ;;  %vm56_vm7 = vcmask 25600  }
   0x8   :  { %1176 = vst.msk [vmem:[#allocation3 + $0x20] sm:$0xff] %vm53_vm3, %v2462_v0  ;;  %54 = vst.msk [vmem:[#allocation2] sm:$0xff] %vm53_vm3, %v2462_v0  ;;  %2083 = vmatprep.subr.bf16.mxu0 %v2413_v8  ;;  %v2418_v19 = vld [vmem:[%s3054_s5] sm:$0xff]   ;;  %v274_v20 = vpack.c.bf16 %v272_v18, %v271_v17  ;;  %v2420_v22 = vld [vmem:[%s3054_s5 + $0x10] sm:$0xff]   ;;  %vm64_vm8 = vcmask 583200   ;;  %vm148_vm9 = vcmask 548896  }
   0x9   :  { %63 = vst.msk [vmem:[#allocation2 + $0x8] sm:$0xff] %vm61_vm4, %v2462_v0  ;;  %67 = vst.msk [vmem:[#allocation2 + $0x20] sm:$0xff] %vm61_vm4, %v2462_v0  ;;  %v2421_v23 = vld [vmem:[%s3054_s5 + $0x18] sm:$0xff]   ;;  %v2422_v24 = vld [vmem:[%s3054_s5 + $0x20] ss:$0 sps:$4 sm:$0xff]   ;;  %vm151_vm10 = vcmask 549921  }
   0xa   :  { %2072 = vmatmul.mubr.msk.bf16.vlgmr.msra.gmra.mrb[0].mxu0 %vm95_vm1, %v71_v7  ;;  %2080 = vmatmul.mubr.msk.bf16.vlgmr.msra.gmra.mrb[0].mxu1 %vm95_vm1, %v71_v7  ;;  %58 = vst.msk [vmem:[#allocation2 + $0x18] sm:$0xff] %vm53_vm3, %v2462_v0  ;;  %1172 = vst.msk [vmem:[#allocation3] sm:$0xff] %vm53_vm3, %v2462_v0  ;;  %v1803_v25 = vld [vmem:[%s3055_s3] ss:$0 sm:$0xff]  ;;  %v424_v26 = vsel %vm324_vm5, %v2422_v24, 0  ;;  %v2667_v37 = vld [vmem:[%s3052_s4 + $0x24] sm:$0xff]  }
   0xb   :  { %1175 = vst.msk [vmem:[#allocation3 + $0x18] sm:$0xff] %vm53_vm3, %v2462_v0  ;;  %2084 = vmatpush3.bf16.msra.mxu0 %v2413_v8  ;;  %2093 = vmatprep.mubr.msk.bf16.mxu0 %vm317_vm6, %v273_v14  ;;  %v901_v40 = vld [vmem:[%s3056_s13] sm:$0xff]  ;;  %v902_v41 = vld [vmem:[%s3056_s13 + $0x8] sm:$0xff]  ;;  %v903_v42 = vld [vmem:[%s3056_s13 + $0x10] sm:$0xff]  ;;  %vm154_vm11 = vcmask 550946   ;;  %vm157_vm12 = vcmask 551971  }
   0xc   :  { %1179 = vst.msk [vmem:[#allocation3 + $0x8] sm:$0xff] %vm61_vm4, %v2462_v0  ;;  %1182 = vst.msk [vmem:[#allocation3 + $0x20] sm:$0xff] %vm61_vm4, %v2462_v0  ;;  %2085 = vmatprep.subr.bf16.mxu0 %v2414_v9  ;;  %v2682_v43 = vpack.c.bf16 %v902_v41, %v901_v40  ;;  %v904_v44 = vld [vmem:[%s3056_s13 + $0x18] sm:$0xff]  ;;  %v905_v46 = vld [vmem:[%s3056_s13 + $0x20] sm:$0xff]  ;;  %vm160_vm13 = vcmask 552996   ;;  %vm163_vm14 = vcmask 554021  }
   0xd   :  { %62 = vst.msk [vmem:[#allocation2] sm:$0xff] %vm61_vm4, %v2462_v0  ;;  %66 = vst.msk [vmem:[#allocation2 + $0x18] sm:$0xff] %vm61_vm4, %v2462_v0  ;;  %v2687_v45 = vpack.c.bf16 %v904_v44, %v903_v42  ;;  %v906_v47 = vld [vmem:[%s3056_s13 + $0x28] sm:$0xff]  ;;  %vm166_vm15 = vcmask 555046   ;;  %vm169_vm0 = vcmask 556071   ;;  %v2425_v63 = vld [vmem:[%s3052_s4 + $0x34] sm:$0xff]  }
   0xe   :  { %1178 = vst.msk [vmem:[#allocation3] sm:$0xff] %vm61_vm4, %v2462_v0  ;;  %1181 = vst.msk [vmem:[#allocation3 + $0x18] sm:$0xff] %vm61_vm4, %v2462_v0  ;;  %2298 = vmatprep.subr.bf16.mxu1 %v2682_v43  ;;  %v2698_v48 = vpack.c.bf16 %v906_v47, %v905_v46  ;;  %v479_v53 = vld [vmem:[%s3053_s1 + $0x1] sm:$0xff]  ;;  %v480_v54 = vld [vmem:[%s3053_s1 + $0x9] sm:$0xff]  ;;  %vm909_vm1 = vcmask 523264   ;;  %vm1200_vm2 = vcmask 556064  }
   0xf   :  { %2086 = vmatpush3.bf16.msra.mxu0 %v2414_v9  ;;  %57 = vst.msk [vmem:[#allocation2 + $0x10] sm:$0x3] %vm56_vm7, %v2462_v0  ;;  %60 = vst.msk [vmem:[#allocation2 + $0x28] sm:$0x3] %vm56_vm7, %v2462_v0  ;;  %2300 = vmatpush3.bf16.msra.mxu1 %v2682_v43  ;;  %v483_v60 = vpack.c.bf16 %v480_v54, %v479_v53  ;;  %v2424_v62 = vld [vmem:[%s3052_s4 + $0x2c] sm:$0xff]   ;;  %v481_v2 = vld [vmem:[%s3053_s1 + $0x19] sm:$0xff] }
  0x10   :  { %2087 = vmatprep.subr.bf16.mxu0 %v2415_v10  ;;  %1174 = vst.msk [vmem:[#allocation3 + $0x10] sm:$0x3] %vm56_vm7, %v2462_v0  ;;  %1177 = vst.msk [vmem:[#allocation3 + $0x28] sm:$0x3] %vm56_vm7, %v2462_v0  ;;  %2302 = vmatprep.subr.bf16.mxu1 %v2687_v45  ;;  %v2427_v1 = vld [vmem:[%s3052_s4 + $0x44] ss:$0 sps:$4 sm:$0xff]  }
  0x11   :  { %65 = vst.msk [vmem:[#allocation2 + $0x10] sm:$0x3] %vm64_vm8, %v2462_v0  ;;  %68 = vst.msk [vmem:[#allocation2 + $0x28] sm:$0x3] %vm64_vm8, %v2462_v0  ;;  %v482_v3 = vld [vmem:[%s3053_s1 + $0x21] sm:$0xff]  ;;  %v535_v4 = vsel %vm324_vm5, %v2427_v1, 0 }
  0x12   :  { %1180 = vst.msk [vmem:[#allocation3 + $0x10] sm:$0x3] %vm64_vm8, %v2462_v0  ;;  %1183 = vst.msk [vmem:[#allocation3 + $0x28] sm:$0x3] %vm64_vm8, %v2462_v0  ;;  %v2426_v0 = vld [vmem:[%s3052_s4 + $0x3c] sm:$0xff]   ;;  %v2428_v5 = vld [vmem:[%s3054_s5 + $0x24] sm:$0xff]   ;;  %v484_v6 = vpack.c.bf16 %v482_v3, %v481_v2 }
  0x13   :  { %2088 = vmatpush3.bf16.msra.mxu0 %v2415_v10  ;;  %2304 = vmatpush3.bf16.msra.mxu1 %v2687_v45  ;;  %v2429_v9 = vld [vmem:[%s3054_s5 + $0x2c] sm:$0xff]   ;;  %v2431_v12 = vld [vmem:[%s3054_s5 + $0x3c] sm:$0xff]   ;;  %v2432_v13 = vld [vmem:[%s3054_s5 + $0x44] ss:$0 sps:$4 sm:$0xff]  }
  0x14   :  { %2089 = vmatprep.subr.bf16.mxu0 %v2416_v15  ;;  %2306 = vmatprep.subr.bf16.mxu1 %v2698_v48  ;;  %v634_v14 = vsel %vm324_vm5, %v2432_v13, 0  ;;  %v690_v17 = vld [vmem:[%s3053_s1 + $0xa] sm:$0xff]  ;;  %v908_v44 = vld [vmem:[%s3056_s13 + $0x38] sm:$0xff]  ;;  %v1815_v47 = vld [vmem:[%s3057_s6] ss:$0 sm:$0xff] }
  0x15   :  { %v907_v42 = vld [vmem:[%s3056_s13 + $0x30] sm:$0xff] }
  0x16   :  { %v2841_v46 = vpack.c.bf16 %v908_v44, %v907_v42 }
  0x17   :  { %2090 = vmatpush3.bf16.msra.mxu0 %v2416_v15  ;;  %2308 = vmatpush3.bf16.msra.mxu1 %v2698_v48  ;;  %v2433_v15 = vld [vmem:[%s3052_s4 + $0x48] sm:$0xff]  }
  0x18   :  { %2397 = vmatprep.subr.msk.bf16.mxu0 %vm324_vm5, %v2417_v11  ;;  %v2430_v11 = vld [vmem:[%s3054_s5 + $0x34] sm:$0xff]   ;;  %2310 = vmatprep.subr.bf16.mxu1 %v2841_v46 }
  0x1b   :  { %2092 = vmatpush3.bf16.msra.mxu0 %v326_v16  ;;  %v689_v16 = vld [vmem:[%s3053_s1 + $0x2] sm:$0xff]  ;;  %2312 = vmatpush3.bf16.msra.mxu1 %v2841_v46 }
  0x1c   :  { %2097 = vmatprep.subr.bf16.mxu0 %v2418_v19  ;;  %2314 = vmatprep.subr.bf16.mxu1 %v2682_v43 }
  0x1e   :  { %2094 = vmatmul.mubr.msk.bf16.vlgmr.msra.gmra.mrb[4].mxu0 %vm317_vm6, %v274_v20  ;;  %v693_v20 = vpack.c.bf16 %v690_v17, %v689_v16 }
  0x1f   :  { %2098 = vmatpush3.bf16.msra.mxu0 %v2418_v19 }
  0x20   :  { %2099 = vmatprep.subr.bf16.mxu0 %v2419_v21 }
  0x23   :  { %2100 = vmatpush3.bf16.msra.mxu0 %v2419_v21 }
  0x24   :  { %2101 = vmatprep.subr.bf16.mxu0 %v2420_v22 }
  0x27   :  { %2102 = vmatpush3.bf16.msra.mxu0 %v2420_v22  ;;  %v2434_v22 = vld [vmem:[%s3052_s4 + $0x50] sm:$0xff]  }
  0x28   :  { %2103 = vmatprep.subr.bf16.mxu0 %v2421_v23 }
  0x2b   :  { %2104 = vmatpush3.bf16.msra.mxu0 %v2421_v23  ;;  %v2435_v23 = vld [vmem:[%s3052_s4 + $0x58] sm:$0xff]  }
  0x2c   :  { %2398 = vmatprep.subr.msk.bf16.mxu0 %vm324_vm5, %v2422_v24  ;;  %v2436_v24 = vld [vmem:[%s3052_s4 + $0x60] sm:$0xff]  }
  0x2f   :  { %2106 = vmatpush3.bf16.msra.mxu0 %v424_v26  ;;  %v691_v26 = vld [vmem:[%s3053_s1 + $0x1a] sm:$0xff] }
  0x30   :  { %2111 = vmatprep.subr.bf16.mxu0 %v2667_v37 }
  0xdd   :  { %v133_v27 = vpop.f32.mrb[0].mxu0  ;;  %v230_v30 = vpop.f32.mrb[0].mxu1 }
  0xde   :  { %v134_v28 = vadd.f32 %v1803_v25, %v133_v27  ;;  %v2073_v29 = vpop.f32.mrb[1].mxu0  ;;  %v2081_v32 = vpop.f32.mrb[1].mxu1  ;;  %v231_v33 = vadd.f32 %v1803_v25, %v230_v30  ;;  %v692_v27 = vld [vmem:[%s3053_s1 + $0x22] sm:$0xff] }
  0xdf   :  { %v136_v31 = vpop.f32.mrb[2].mxu0  ;;  %v233_v35 = vpop.f32.mrb[2].mxu1  ;;  %v2438_v29 = vld [vmem:[%s3054_s5 + $0x48] sm:$0xff]   ;;  %v694_v30 = vpack.c.bf16 %v692_v27, %v691_v26 }
  0xe0   :  { %v137_v34 = vadd.f32 %v1803_v25, %v136_v31  ;;  %142 = vrot.lane.b32.xlu0 %v134_v28, %s2464_s19  ;;  %v2074_v36 = vpop.f32.mrb[3].mxu0  ;;  %v2082_v38 = vpop.f32.mrb[3].mxu1  ;;  %v234_v39 = vadd.f32 %v1803_v25, %v233_v35  ;;  %v2437_v25 = vld [vmem:[%s3052_s4 + $0x68] ss:$0 sps:$4 sm:$0xff]   ;;  %v2440_v35 = vld [vmem:[%s3054_s5 + $0x58] sm:$0xff]  }
  0xe1   :  { %v745_v28 = vsel %vm324_vm5, %v2437_v25, 0  ;;  %v2441_v36 = vld [vmem:[%s3054_s5 + $0x60] sm:$0xff]  }
  0xe2   :  { %144 = vrot.lane.b32.xlu1 %v137_v34, %s2464_s19 }
  0xe4   :  { %239 = vrot.lane.b32.xlu0 %v231_v33, %s2464_s19  ;;  %v2439_v33 = vld [vmem:[%s3054_s5 + $0x50] sm:$0xff]  }
  0xe6   :  { %241 = vrot.lane.b32.xlu1 %v234_v39, %s2464_s19 }
 0x152   :  { %v143_v49 = vpop.permute.xlu0 %142 }
 0x153   :  { %149 = vst.msk [vmem:[#allocation2 + $0x1] sm:$0x1] %vm148_vm9, %v143_v49 }
 0x154   :  { %152 = vst.msk [vmem:[#allocation2 + $0x2] sm:$0x2] %vm151_vm10, %v143_v49  ;;  %v145_v50 = vpop.permute.xlu1 %144 }
 0x155   :  { %155 = vst.msk [vmem:[#allocation2 + $0x3] sm:$0x4] %vm154_vm11, %v143_v49  ;;  %156 = vst.msk [vmem:[#allocation2 + $0x1b] sm:$0x4] %vm154_vm11, %v145_v50 }
 0x156   :  { %158 = vst.msk [vmem:[#allocation2 + $0x4] sm:$0x8] %vm157_vm12, %v143_v49  ;;  %159 = vst.msk [vmem:[#allocation2 + $0x1c] sm:$0x8] %vm157_vm12, %v145_v50  ;;  %v240_v51 = vpop.permute.xlu0 %239 }
 0x157   :  { %161 = vst.msk [vmem:[#allocation2 + $0x5] sm:$0x10] %vm160_vm13, %v143_v49  ;;  %162 = vst.msk [vmem:[#allocation2 + $0x1d] sm:$0x10] %vm160_vm13, %v145_v50 }
 0x158   :  { %164 = vst.msk [vmem:[#allocation2 + $0x6] sm:$0x20] %vm163_vm14, %v143_v49  ;;  %165 = vst.msk [vmem:[#allocation2 + $0x1e] sm:$0x20] %vm163_vm14, %v145_v50  ;;  %v242_v52 = vpop.permute.xlu1 %241 }
 0x159   :  { %167 = vst.msk [vmem:[#allocation2 + $0x7] sm:$0x40] %vm166_vm15, %v143_v49  ;;  %168 = vst.msk [vmem:[#allocation2 + $0x1f] sm:$0x40] %vm166_vm15, %v145_v50 }
 0x15a   :  { %170 = vst.msk [vmem:[#allocation2 + $0x8] sm:$0x80] %vm169_vm0, %v143_v49  ;;  %171 = vst.msk [vmem:[#allocation2 + $0x20] sm:$0x80] %vm169_vm0, %v145_v50 }
 0x15b   :  { %150 = vst.msk [vmem:[#allocation2 + $0x19] sm:$0x1] %vm148_vm9, %v145_v50  ;;  %245 = vst.msk [vmem:[#allocation2 + $0x2] sm:$0x1] %vm148_vm9, %v240_v51 }
 0x15c   :  { %153 = vst.msk [vmem:[#allocation2 + $0x1a] sm:$0x2] %vm151_vm10, %v145_v50  ;;  %247 = vst.msk [vmem:[#allocation2 + $0x3] sm:$0x2] %vm151_vm10, %v240_v51 }
 0x15d   :  { %249 = vst.msk [vmem:[#allocation2 + $0x4] sm:$0x4] %vm154_vm11, %v240_v51  ;;  %250 = vst.msk [vmem:[#allocation2 + $0x1c] sm:$0x4] %vm154_vm11, %v242_v52 }
 0x15e   :  { %251 = vst.msk [vmem:[#allocation2 + $0x5] sm:$0x8] %vm157_vm12, %v240_v51  ;;  %252 = vst.msk [vmem:[#allocation2 + $0x1d] sm:$0x8] %vm157_vm12, %v242_v52 }
 0x15f   :  { %253 = vst.msk [vmem:[#allocation2 + $0x6] sm:$0x10] %vm160_vm13, %v240_v51  ;;  %254 = vst.msk [vmem:[#allocation2 + $0x1e] sm:$0x10] %vm160_vm13, %v242_v52 }
 0x160   :  { %255 = vst.msk [vmem:[#allocation2 + $0x7] sm:$0x20] %vm163_vm14, %v240_v51  ;;  %256 = vst.msk [vmem:[#allocation2 + $0x1f] sm:$0x20] %vm163_vm14, %v242_v52 }
 0x161   :  { %257 = vst.msk [vmem:[#allocation2 + $0x8] sm:$0x40] %vm166_vm15, %v240_v51  ;;  %258 = vst.msk [vmem:[#allocation2 + $0x20] sm:$0x40] %vm166_vm15, %v242_v52 }
 0x162   :  { %259 = vst.msk [vmem:[#allocation2 + $0x9] sm:$0x80] %vm169_vm0, %v240_v51  ;;  %260 = vst.msk [vmem:[#allocation2 + $0x21] sm:$0x80] %vm169_vm0, %v242_v52 }
 0x163   :  { %246 = vst.msk [vmem:[#allocation2 + $0x1a] sm:$0x1] %vm148_vm9, %v242_v52 }
 0x164   :  { %248 = vst.msk [vmem:[#allocation2 + $0x1b] sm:$0x2] %vm151_vm10, %v242_v52  ;;  %v275_v55 = vld [vmem:[#allocation2] sm:$0xff] }
 0x165   :  { %v485_v7 = vld [vmem:[#allocation2 + $0x1] sm:$0xff] }
 0x166   :  { %v695_v31 = vld [vmem:[#allocation2 + $0x2] sm:$0xff] }
 0x168   :  { %v276_v56 = vld [vmem:[#allocation2 + $0x8] sm:$0xff]  ;;  %v278_v59 = vld [vmem:[#allocation2 + $0x20] sm:$0xff] }
 0x169   :  { %v279_v57 = vpack.c.bf16 %v276_v56, %v275_v55  ;;  %v486_v8 = vld [vmem:[#allocation2 + $0x9] sm:$0xff]  ;;  %v488_v19 = vld [vmem:[#allocation2 + $0x21] sm:$0xff] }
 0x16a   :  { %v489_v10 = vpack.c.bf16 %v486_v8, %v485_v7  ;;  %v696_v32 = vld [vmem:[#allocation2 + $0xa] sm:$0xff]  ;;  %v698_v40 = vld [vmem:[#allocation2 + $0x22] sm:$0xff] }
 0x16b   :  { %v277_v58 = vld [vmem:[#allocation2 + $0x18] sm:$0xff]  ;;  %2107 = vmatprep.mubr.msk.bf16.mxu0 %vm317_vm6, %v279_v57  ;;  %v699_v34 = vpack.c.bf16 %v696_v32, %v695_v31 }
 0x16c   :  { %v280_v61 = vpack.c.bf16 %v278_v59, %v277_v58  ;;  %v487_v18 = vld [vmem:[#allocation2 + $0x19] sm:$0xff] }
 0x16d   :  { %v490_v21 = vpack.c.bf16 %v488_v19, %v487_v18  ;;  %v697_v39 = vld [vmem:[#allocation2 + $0x1a] sm:$0xff] }
 0x16e   :  { %2108 = vmatmul.mubr.msk.bf16.vlgmr.msra.gmra.mrb[4].mxu0 %vm317_vm6, %v280_v61  ;;  %v700_v41 = vpack.c.bf16 %v698_v40, %v697_v39  ;;  %v2443_v61 = vld [vmem:[%s3058_s9] sm:$0xff]   ;;  %v1143_v39 = vlaneseq }
 0x16f   :  { %2112 = vmatpush3.bf16.msra.mxu0 %v2667_v37  ;;  %2121 = vmatprep.mubr.msk.bf16.mxu0 %vm317_vm6, %v483_v60  ;;  %v2442_v37 = vld [vmem:[%s3054_s5 + $0x68] ss:$0 sps:$4 sm:$0xff]  }
 0x170   :  { %2113 = vmatprep.subr.bf16.mxu0 %v2424_v62  ;;  %v844_v38 = vsel %vm324_vm5, %v2442_v37, 0  ;;  %v1144_v40 = vshrl.u32 %v1143_v39, 7 }
 0x172   :  { %v2901_v42 = vsub.s32 0, %v1144_v40  ;;  %v1902_v40 = vld [vmem:[%s3061_s10] ss:$0 sm:$0xff] }
 0x173   :  { %2114 = vmatpush3.bf16.msra.mxu0 %v2424_v62  ;;  %v2444_v62 = vld [vmem:[%s3058_s9 + $0x8] sm:$0xff]  }
 0x174   :  { %2115 = vmatprep.subr.bf16.mxu0 %v2425_v63 }
 0x177   :  { %2116 = vmatpush3.bf16.msra.mxu0 %v2425_v63 }
 0x178   :  { %2117 = vmatprep.subr.bf16.mxu0 %v2426_v0 }
 0x17b   :  { %2118 = vmatpush3.bf16.msra.mxu0 %v2426_v0 }
 0x17c   :  { %2399 = vmatprep.subr.msk.bf16.mxu0 %vm324_vm5, %v2427_v1 }
 0x17f   :  { %2120 = vmatpush3.bf16.msra.mxu0 %v535_v4 }
 0x180   :  { %2125 = vmatprep.subr.bf16.mxu0 %v2428_v5 }
 0x182   :  { %2122 = vmatmul.mubr.msk.bf16.vlgmr.msra.gmra.mrb[4].mxu0 %vm317_vm6, %v484_v6 }
 0x183   :  { %2126 = vmatpush3.bf16.msra.mxu0 %v2428_v5  ;;  %2135 = vmatprep.mubr.msk.bf16.mxu0 %vm317_vm6, %v489_v10 }
 0x184   :  { %2127 = vmatprep.subr.bf16.mxu0 %v2429_v9 }
 0x187   :  { %2128 = vmatpush3.bf16.msra.mxu0 %v2429_v9 }
 0x188   :  { %2129 = vmatprep.subr.bf16.mxu0 %v2430_v11 }
 0x18b   :  { %2130 = vmatpush3.bf16.msra.mxu0 %v2430_v11 }
 0x18c   :  { %2131 = vmatprep.subr.bf16.mxu0 %v2431_v12 }
 0x18f   :  { %2132 = vmatpush3.bf16.msra.mxu0 %v2431_v12 }
 0x190   :  { %2400 = vmatprep.subr.msk.bf16.mxu0 %vm324_vm5, %v2432_v13 }
 0x193   :  { %2134 = vmatpush3.bf16.msra.mxu0 %v634_v14 }
 0x194   :  { %2139 = vmatprep.subr.bf16.mxu0 %v2433_v15 }
 0x196   :  { %2136 = vmatmul.mubr.msk.bf16.vlgmr.msra.gmra.mrb[4].mxu0 %vm317_vm6, %v490_v21 }
 0x197   :  { %2140 = vmatpush3.bf16.msra.mxu0 %v2433_v15  ;;  %2149 = vmatprep.mubr.msk.bf16.mxu0 %vm317_vm6, %v693_v20 }
 0x198   :  { %2141 = vmatprep.subr.bf16.mxu0 %v2434_v22 }
 0x19b   :  { %2142 = vmatpush3.bf16.msra.mxu0 %v2434_v22 }
 0x19c   :  { %2143 = vmatprep.subr.bf16.mxu0 %v2435_v23 }
 0x19f   :  { %2144 = vmatpush3.bf16.msra.mxu0 %v2435_v23 }
 0x1a0   :  { %2145 = vmatprep.subr.bf16.mxu0 %v2436_v24 }
 0x1a3   :  { %2146 = vmatpush3.bf16.msra.mxu0 %v2436_v24 }
 0x1a4   :  { %2401 = vmatprep.subr.msk.bf16.mxu0 %vm324_vm5, %v2437_v25 }
 0x1a7   :  { %2148 = vmatpush3.bf16.msra.mxu0 %v745_v28 }
 0x1a8   :  { %2153 = vmatprep.subr.bf16.mxu0 %v2438_v29 }
 0x1aa   :  { %2150 = vmatmul.mubr.msk.bf16.vlgmr.msra.gmra.mrb[4].mxu0 %vm317_vm6, %v694_v30 }
 0x1ab   :  { %2154 = vmatpush3.bf16.msra.mxu0 %v2438_v29  ;;  %2163 = vmatprep.mubr.msk.bf16.mxu0 %vm317_vm6, %v699_v34 }
 0x1ac   :  { %2155 = vmatprep.subr.bf16.mxu0 %v2439_v33 }
 0x1af   :  { %2156 = vmatpush3.bf16.msra.mxu0 %v2439_v33 }
 0x1b0   :  { %2157 = vmatprep.subr.bf16.mxu0 %v2440_v35 }
 0x1b3   :  { %2158 = vmatpush3.bf16.msra.mxu0 %v2440_v35 }
 0x1b4   :  { %2159 = vmatprep.subr.bf16.mxu0 %v2441_v36 }
 0x1b7   :  { %2160 = vmatpush3.bf16.msra.mxu0 %v2441_v36 }
 0x1b8   :  { %2402 = vmatprep.subr.msk.bf16.mxu0 %vm324_vm5, %v2442_v37 }
 0x1bb   :  { %2162 = vmatpush3.bf16.msra.mxu0 %v844_v38 }
 0x1be   :  { %2164 = vmatmul.mubr.msk.bf16.vlgmr.msra.gmra.mrb[4].mxu0 %vm317_vm6, %v700_v41  ;;  %v899_v41 = vld [vmem:[%s3059_s7] sm:$0x1] }
 0x291   :  { %v2165_v49 = vpop.f32.mrb[4].mxu0 }
 0x292   :  { %v880_v50 = vpop.f32.mrb[5].mxu0  ;;  %v2855_v55 = vadd.f32 %v2165_v49, %v1815_v47 }
 0x293   :  { %v2849_v51 = vadd.f32 %v1815_v47, %v880_v50  ;;  %v2166_v52 = vpop.f32.mrb[6].mxu0  ;;  %v900_v50 = vld [vmem:[%s3060_s8] sm:$0x1] }
 0x294   :  { %v883_v53 = vpop.f32.mrb[7].mxu0  ;;  %v2862_v56 = vadd.f32 %v2166_v52, %v1815_v47  ;;  %v1022_v59 = vmul.f32 %v2855_v55, %v2855_v55 }
 0x295   :  { %v2851_v54 = vadd.f32 %v1815_v47, %v883_v53  ;;  %2183 = vmatprep.mubr.msk.f32.mxu1 %vm909_vm1, %v2849_v51  ;;  %v1020_v57 = vmul.f32 %v2849_v51, %v2849_v51  ;;  %v2445_v47 = vld [vmem:[%s3058_s9 + $0x10] sm:$0xff]  }
 0x296   :  { %v1023_v60 = vmul.f32 %v2862_v56, %v2862_v56 }
 0x297   :  { %2184 = vmatmul.mubr.msk.f32.vlgmr.msra.gmra.mrb[4].mxu1 %vm909_vm1, %v2851_v54  ;;  %v1021_v58 = vmul.f32 %v2851_v54, %v2851_v54 }
 0x298   :  { %2316 = vmatpush3.bf16.msra.mxu1 %v2682_v43  ;;  %2186 = vmatprep.mubr.msk.f32.mxu1 %vm909_vm1, %v2855_v55 }
 0x299   :  { %2318 = vmatprep.subr.bf16.mxu1 %v2687_v45 }
 0x29b   :  { %2187 = vmatmul.mubr.msk.f32.gmra.mrb[6].mxu1 %vm909_vm1, %v2862_v56 }
 0x29c   :  { %2320 = vmatpush3.bf16.msra.mxu1 %v2687_v45  ;;  %2205 = vmatprep.mubr.msk.f32.mxu1 %vm909_vm1, %v1020_v57  ;;  %v2446_v57 = vld [vmem:[%s3058_s9 + $0x18] sm:$0xff]  }
 0x29d   :  { %2322 = vmatprep.subr.bf16.mxu1 %v2698_v48 }
 0x2a0   :  { %2324 = vmatpush3.bf16.msra.mxu1 %v2698_v48 }
 0x2a1   :  { %2326 = vmatprep.subr.bf16.mxu1 %v2841_v46 }
 0x2a4   :  { %2328 = vmatpush3.bf16.msra.mxu1 %v2841_v46 }
 0x2a5   :  { %2211 = vmatprep.subr.bf16.mxu1 %v2443_v61 }
 0x2a7   :  { %2206 = vmatmul.mubr.msk.f32.vlgmr.msra.gmra.mrb[8].mxu1 %vm909_vm1, %v1021_v58  ;;  %v2447_v58 = vld [vmem:[%s3058_s9 + $0x20] ss:$0 sps:$4 sm:$0xff]  }
 0x2a8   :  { %2208 = vmatprep.mubr.msk.f32.mxu1 %vm909_vm1, %v1022_v59  ;;  %2212 = vmatpush3.bf16.msra.mxu1 %v2443_v61 }
 0x2a9   :  { %2213 = vmatprep.subr.bf16.mxu1 %v2444_v62 }
 0x2ab   :  { %2209 = vmatmul.mubr.msk.f32.gmra.mrb[10].mxu1 %vm909_vm1, %v1023_v60 }
 0x2ac   :  { %2214 = vmatpush3.bf16.msra.mxu1 %v2444_v62 }
 0x2ad   :  { %2215 = vmatprep.subr.bf16.mxu1 %v2445_v47 }
 0x2b0   :  { %2216 = vmatpush3.bf16.msra.mxu1 %v2445_v47 }
 0x2b1   :  { %2217 = vmatprep.subr.bf16.mxu1 %v2446_v57 }
 0x2b4   :  { %2218 = vmatpush3.bf16.msra.mxu1 %v2446_v57 }
 0x2b5   :  { %2403 = vmatprep.subr.msk.bf16.mxu1 %vm324_vm5, %v2447_v58 }
 0x36a   :  { %v2185_v63 = vpop.f32.mrb[4].mxu1 }
 0x36b   :  { %v1008_v0 = vsel %vm909_vm1, %v2185_v63, 0.0  ;;  %v988_v1 = vpop.f32.mrb[5].mxu1 }
 0x36c   :  { %v1007_v2 = vsel %vm909_vm1, %v988_v1, 0.0  ;;  %v1262_v1 = vsel %vm324_vm5, %v2447_v58, 0 }
 0x36d   :  { %v1009_v3 = vadd.f32 %v1008_v0, %v1007_v2  ;;  %2220 = vmatpush3.bf16.msra.mxu1 %v1262_v1 }
 0x36e   :  { %v2188_v4 = vpop.f32.mrb[6].mxu1 }
 0x36f   :  { %v998_v5 = vpop.f32.mrb[7].mxu1  ;;  %v1012_v8 = vsel %vm909_vm1, %v2188_v4, 0.0 }
 0x370   :  { %v1010_v6 = vsel %vm909_vm1, %v998_v5, 0.0 }
 0x371   :  { %v1011_v7 = vadd.f32 %v1010_v6, %v1009_v3 }
 0x373   :  { %v1013_v9 = vadd.f32 %v1012_v8, %v1011_v7 }
 0x375   :  { %v1014_v10 = vrot.slane %v1013_v9, 4 }
 0x377   :  { %v1015_v11 = vadd.f32 %v1014_v10, %v1013_v9 }
 0x379   :  { %v1016_v16 = vrot.slane %v1015_v11, 2 }
 0x37a   :  { %v2207_v12 = vpop.f32.mrb[8].mxu1 }
 0x37b   :  { %v1122_v13 = vsel %vm909_vm1, %v2207_v12, 0.0  ;;  %v1102_v14 = vpop.f32.mrb[9].mxu1  ;;  %v1017_v21 = vadd.f32 %v1016_v16, %v1015_v11 }
 0x37c   :  { %v1121_v15 = vsel %vm909_vm1, %v1102_v14, 0.0 }
 0x37d   :  { %v1123_v17 = vadd.f32 %v1122_v13, %v1121_v15  ;;  %v1018_v25 = vrot.slane %v1017_v21, 1 }
 0x37e   :  { %v2210_v18 = vpop.f32.mrb[10].mxu1 }
 0x37f   :  { %v1112_v19 = vpop.f32.mrb[11].mxu1  ;;  %v1126_v23 = vsel %vm909_vm1, %v2210_v18, 0.0  ;;  %v1019_v28 = vadd.f32 %v1018_v25, %v1017_v21  ;;  %v2450_v21 = vld [vmem:[%s3058_s9 + $0x34] sm:$0xff]   ;;  %v2453_v25 = vld [vmem:[%s3058_s9 + $0x48] sm:$0xff]  }
 0x380   :  { %v1124_v20 = vsel %vm909_vm1, %v1112_v19, 0.0  ;;  %v2449_v19 = vld [vmem:[%s3058_s9 + $0x2c] sm:$0xff]  }
 0x381   :  { %v1125_v22 = vadd.f32 %v1124_v20, %v1123_v17  ;;  %v1134_v31 = vmul.f32 0.001953125, %v1019_v28 }
 0x383   :  { %v1127_v24 = vadd.f32 %v1126_v23, %v1125_v22  ;;  %v1136_v34 = vmul.f32 %v1134_v31, %v1134_v31  ;;  %v2451_v22 = vld [vmem:[%s3058_s9 + $0x3c] sm:$0xff]   ;;  %v2452_v23 = vld [vmem:[%s3058_s9 + $0x44] ss:$0 sps:$4 sm:$0xff]  }
 0x385   :  { %v1128_v26 = vrot.slane %v1127_v24, 4 }
 0x387   :  { %v1129_v27 = vadd.f32 %v1128_v26, %v1127_v24  ;;  %v1367_v24 = vsel %vm324_vm5, %v2452_v23, 0 }
 0x389   :  { %v1130_v29 = vrot.slane %v1129_v27, 2 }
 0x38b   :  { %v1131_v30 = vadd.f32 %v1130_v29, %v1129_v27 }
 0x38d   :  { %v1132_v32 = vrot.slane %v1131_v30, 1 }
 0x38f   :  { %v1133_v33 = vadd.f32 %v1132_v32, %v1131_v30 }
 0x391   :  { %v1135_v35 = vmul.f32 0.001953125, %v1133_v33  ;;  %v2455_v33 = vld [vmem:[%s3058_s9 + $0x58] sm:$0xff]  }
 0x393   :  { %v1137_v36 = vsub.f32 %v1135_v35, %v1136_v34  ;;  %v2456_v34 = vld [vmem:[%s3058_s9 + $0x60] sm:$0xff]   ;;  %v2457_v35 = vld [vmem:[%s3058_s9 + $0x68] ss:$0 sps:$4 sm:$0xff]  }
 0x395   :  { %v1138_v37 = vmax.f32 %v1137_v36, 0.0  ;;  %v1472_v36 = vsel %vm324_vm5, %v2457_v35, 0 }
 0x397   :  { %v1139_v38 = vadd.f32 1e-05, %v1138_v37 }
 0x399   :  { %2458 = vrsqrt.f32 %v1139_v38 }
 0x3a3   :  { %v2459_v44 = vpop.eup %2458 }
 0x3a4   :  { %v1141_v49 = vmul.f32 %v2459_v44, %v899_v41 }
 0x3a6   :  { %v1146_v52 = vrot.slane %v1141_v49, %v2901_v42  ;;  %v1152_v53 = vmul.f32 %v1141_v49, %v1134_v31  ;;  %v2454_v31 = vld [vmem:[%s3058_s9 + $0x50] sm:$0xff]  }
 0x3a8   :  { %v1153_v59 = vsub.f32 %v900_v50, %v1152_v53  ;;  %v1149_v60 = vmul.f32 %v2851_v54, %v1146_v52  ;;  %v1148_v62 = vmul.f32 %v2849_v51, %v1146_v52  ;;  %v1151_v63 = vmul.f32 %v2862_v56, %v1146_v52  ;;  %v2448_v54 = vld [vmem:[%s3058_s9 + $0x24] sm:$0xff]  }
 0x3a9   :  { %v1150_v0 = vmul.f32 %v2855_v55, %v1146_v52  ;;  %2225 = vmatprep.subr.bf16.mxu1 %v2448_v54 }
 0x3aa   :  { %v1158_v61 = vrot.slane %v1153_v59, %v2901_v42 }
 0x3ac   :  { %v1161_v2 = vadd.f32 %v1158_v61, %v1149_v60  ;;  %v1160_v3 = vadd.f32 %v1158_v61, %v1148_v62  ;;  %v1163_v4 = vadd.f32 %v1158_v61, %v1151_v63  ;;  %v1162_v5 = vadd.f32 %v1158_v61, %v1150_v0 }
 0x3ae   :  { %v1165_v6 = vmax.f32 %v1161_v2, 0.0  ;;  %v1164_v7 = vmax.f32 %v1160_v3, 0.0  ;;  %v1167_v51 = vmax.f32 %v1163_v4, 0.0  ;;  %v1166_v55 = vmax.f32 %v1162_v5, 0.0 }
 0x3b0   :  { %1190 = vrot.lane.b32.xlu1 %v1165_v6, %s2464_s19  ;;  %1188 = vrot.lane.b32.xlu0 %v1164_v7, %s2464_s19 }
 0x3b4   :  { %1194 = vrot.lane.b32.xlu1 %v1167_v51, %s2464_s19  ;;  %1192 = vrot.lane.b32.xlu0 %v1166_v55, %s2464_s19 }
 0x422   :  { %v1191_v56 = vpop.permute.xlu1 %1190  ;;  %v1189_v8 = vpop.permute.xlu0 %1188 }
 0x423   :  { %1202 = vst.msk [vmem:[#allocation3 + $0x9] sm:$0xff] %vm1200_vm2, %v1191_v56  ;;  %1201 = vst.msk [vmem:[#allocation3 + $0x1] sm:$0xff] %vm1200_vm2, %v1189_v8 }
 0x426   :  { %v1195_v9 = vpop.permute.xlu1 %1194  ;;  %v1193_v10 = vpop.permute.xlu0 %1192 }
 0x427   :  { %1204 = vst.msk [vmem:[#allocation3 + $0x21] sm:$0xff] %vm1200_vm2, %v1195_v9  ;;  %1203 = vst.msk [vmem:[#allocation3 + $0x19] sm:$0xff] %vm1200_vm2, %v1193_v10 }
 0x42a   :  { %v1213_v11 = vld [vmem:[#allocation3] sm:$0xff]  ;;  %v1214_v12 = vld [vmem:[#allocation3 + $0x8] sm:$0xff] }
 0x42b   :  { %v1217_v13 = vpack.c.bf16 %v1214_v12, %v1213_v11  ;;  %v1317_v14 = vld [vmem:[#allocation3 + $0x1] sm:$0xff]  ;;  %v1318_v15 = vld [vmem:[#allocation3 + $0x9] sm:$0xff] }
 0x42c   :  { %v1321_v20 = vpack.c.bf16 %v1318_v15, %v1317_v14  ;;  %v1422_v28 = vld [vmem:[#allocation3 + $0x2] sm:$0xff]  ;;  %v1423_v29 = vld [vmem:[#allocation3 + $0xa] sm:$0xff] }
 0x42d   :  { %2221 = vmatprep.mubr.msk.bf16.mxu1 %vm317_vm6, %v1217_v13  ;;  %v1426_v32 = vpack.c.bf16 %v1423_v29, %v1422_v28 }
 0x42e   :  { %v1215_v16 = vld [vmem:[#allocation3 + $0x18] sm:$0xff]  ;;  %v1216_v17 = vld [vmem:[#allocation3 + $0x20] sm:$0xff] }
 0x42f   :  { %v1218_v18 = vpack.c.bf16 %v1216_v17, %v1215_v16  ;;  %v1319_v26 = vld [vmem:[#allocation3 + $0x19] sm:$0xff]  ;;  %v1320_v27 = vld [vmem:[#allocation3 + $0x21] sm:$0xff] }
 0x430   :  { %v1322_v30 = vpack.c.bf16 %v1320_v27, %v1319_v26  ;;  %v1424_v37 = vld [vmem:[#allocation3 + $0x1a] sm:$0xff]  ;;  %v1425_v38 = vld [vmem:[#allocation3 + $0x22] sm:$0xff] }
 0x431   :  { %2222 = vmatmul.mubr.msk.bf16.vlgmr.msra.gmra.mrb[12].mxu1 %vm317_vm6, %v1218_v18  ;;  %v1427_v39 = vpack.c.bf16 %v1425_v38, %v1424_v37 }
 0x432   :  { %2226 = vmatpush3.bf16.msra.mxu1 %v2448_v54  ;;  %2235 = vmatprep.mubr.msk.bf16.mxu1 %vm317_vm6, %v1321_v20 }
 0x433   :  { %2227 = vmatprep.subr.bf16.mxu1 %v2449_v19 }
 0x436   :  { %2228 = vmatpush3.bf16.msra.mxu1 %v2449_v19 }
 0x437   :  { %2229 = vmatprep.subr.bf16.mxu1 %v2450_v21 }
 0x43a   :  { %2230 = vmatpush3.bf16.msra.mxu1 %v2450_v21 }
 0x43b   :  { %2231 = vmatprep.subr.bf16.mxu1 %v2451_v22 }
 0x43e   :  { %2232 = vmatpush3.bf16.msra.mxu1 %v2451_v22 }
 0x43f   :  { %2404 = vmatprep.subr.msk.bf16.mxu1 %vm324_vm5, %v2452_v23 }
 0x442   :  { %2234 = vmatpush3.bf16.msra.mxu1 %v1367_v24 }
 0x443   :  { %2239 = vmatprep.subr.bf16.mxu1 %v2453_v25 }
 0x445   :  { %2236 = vmatmul.mubr.msk.bf16.vlgmr.msra.gmra.mrb[12].mxu1 %vm317_vm6, %v1322_v30  ;;  %v1527_v30 = vld [vmem:[%s3062_s11] sm:$0x1] }
 0x446   :  { %2240 = vmatpush3.bf16.msra.mxu1 %v2453_v25  ;;  %2249 = vmatprep.mubr.msk.bf16.mxu1 %vm317_vm6, %v1426_v32 }
 0x447   :  { %2241 = vmatprep.subr.bf16.mxu1 %v2454_v31 }
 0x44a   :  { %2242 = vmatpush3.bf16.msra.mxu1 %v2454_v31 }
 0x44b   :  { %2243 = vmatprep.subr.bf16.mxu1 %v2455_v33 }
 0x44e   :  { %2244 = vmatpush3.bf16.msra.mxu1 %v2455_v33  ;;  %v1528_v33 = vld [vmem:[%s3063_s12] sm:$0x1] }
 0x44f   :  { %2245 = vmatprep.subr.bf16.mxu1 %v2456_v34 }
 0x452   :  { %2246 = vmatpush3.bf16.msra.mxu1 %v2456_v34 }
 0x453   :  { %2405 = vmatprep.subr.msk.bf16.mxu1 %vm324_vm5, %v2457_v35 }
 0x456   :  { %2248 = vmatpush3.bf16.msra.mxu1 %v1472_v36 }
 0x457   :  { %2330 = vmatprep.subr.bf16.mxu1 %v2682_v43 }
 0x459   :  { %2250 = vmatmul.mubr.msk.bf16.vlgmr.msra.gmra.mrb[12].mxu1 %vm317_vm6, %v1427_v39 }
 0x45a   :  { %2332 = vmatpush3.bf16.msra.mxu1 %v2682_v43 }
 0x45b   :  { %2334 = vmatprep.subr.bf16.mxu1 %v2687_v45 }
 0x45e   :  { %2336 = vmatpush3.bf16.msra.mxu1 %v2687_v45 }
 0x45f   :  { %2338 = vmatprep.subr.bf16.mxu1 %v2698_v48 }
 0x462   :  { %2340 = vmatpush3.bf16.msra.mxu1 %v2698_v48 }
 0x463   :  { %2342 = vmatprep.subr.bf16.mxu1 %v2841_v46 }
 0x466   :  { %2344 = vmatpush3.bf16.msra.mxu1 %v2841_v46 }
 0x467   :  { %2346 = vmatprep.subr.bf16.mxu1 %v2682_v43 }
 0x52c   :  { %v2251_v41 = vpop.f32.mrb[12].mxu1 }
 0x52d   :  { %v1508_v44 = vpop.f32.mrb[13].mxu1  ;;  %v2985_v53 = vadd.f32 %v2251_v41, %v1902_v40 }
 0x52e   :  { %v2979_v47 = vadd.f32 %v1902_v40, %v1508_v44  ;;  %v2252_v49 = vpop.f32.mrb[14].mxu1 }
 0x52f   :  { %v1511_v50 = vpop.f32.mrb[15].mxu1  ;;  %v2992_v57 = vadd.f32 %v2252_v49, %v1902_v40  ;;  %v1649_v59 = vmul.f32 %v2985_v53, %v2985_v53 }
 0x530   :  { %v2981_v52 = vadd.f32 %v1902_v40, %v1511_v50  ;;  %2269 = vmatprep.mubr.msk.f32.mxu1 %vm909_vm1, %v2979_v47  ;;  %v1647_v58 = vmul.f32 %v2979_v47, %v2979_v47 }
 0x532   :  { %2270 = vmatmul.mubr.msk.f32.vlgmr.msra.gmra.mrb[16].mxu1 %vm909_vm1, %v2981_v52 }
 0x533   :  { %2348 = vmatpush3.bf16.msra.mxu1 %v2682_v43  ;;  %2272 = vmatprep.mubr.msk.f32.mxu1 %vm909_vm1, %v2985_v53  ;;  %v1648_v43 = vmul.f32 %v2981_v52, %v2981_v52 }
 0x534   :  { %2350 = vmatprep.subr.bf16.mxu1 %v2687_v45 }
 0x536   :  { %2273 = vmatmul.mubr.msk.f32.gmra.mrb[18].mxu1 %vm909_vm1, %v2992_v57 }
 0x537   :  { %2352 = vmatpush3.bf16.msra.mxu1 %v2687_v45  ;;  %2291 = vmatprep.mubr.msk.f32.mxu1 %vm909_vm1, %v1647_v58  ;;  %v1650_v45 = vmul.f32 %v2992_v57, %v2992_v57 }
 0x538   :  { %2354 = vmatprep.subr.bf16.mxu1 %v2698_v48 }
 0x53b   :  { %2356 = vmatpush3.bf16.msra.mxu1 %v2698_v48 }
 0x53c   :  { %2358 = vmatprep.subr.bf16.mxu1 %v2841_v46 }
 0x53f   :  { %2360 = vmatpush3.bf16.msra.mxu1 %v2841_v46 }
 0x542   :  { %2292 = vmatmul.mubr.msk.f32.vlgmr.msra.gmra.mrb[20].mxu1 %vm909_vm1, %v1648_v43 }
 0x543   :  { %2294 = vmatprep.mubr.msk.f32.mxu1 %vm909_vm1, %v1649_v59 }
 0x546   :  { %2295 = vmatmul.mubr.msk.f32.gmra.mrb[22].mxu1 %vm909_vm1, %v1650_v45 }
 0x605   :  { %v2271_v48 = vpop.f32.mrb[16].mxu1 }
 0x606   :  { %v1635_v60 = vsel %vm909_vm1, %v2271_v48, 0.0  ;;  %v1615_v61 = vpop.f32.mrb[17].mxu1 }
 0x607   :  { %v1634_v46 = vsel %vm909_vm1, %v1615_v61, 0.0 }
 0x608   :  { %v1636_v62 = vadd.f32 %v1635_v60, %v1634_v46 }
 0x609   :  { %v2274_v63 = vpop.f32.mrb[18].mxu1 }
 0x60a   :  { %v1625_v0 = vpop.f32.mrb[19].mxu1  ;;  %v1639_v3 = vsel %vm909_vm1, %v2274_v63, 0.0 }
 0x60b   :  { %v1637_v1 = vsel %vm909_vm1, %v1625_v0, 0.0 }
 0x60c   :  { %v1638_v2 = vadd.f32 %v1637_v1, %v1636_v62 }
 0x60e   :  { %v1640_v4 = vadd.f32 %v1639_v3, %v1638_v2 }
 0x610   :  { %v1641_v5 = vrot.slane %v1640_v4, 4 }
 0x612   :  { %v1642_v54 = vadd.f32 %v1641_v5, %v1640_v4 }
 0x614   :  { %v1643_v56 = vrot.slane %v1642_v54, 2 }
 0x615   :  { %v2293_v6 = vpop.f32.mrb[20].mxu1 }
 0x616   :  { %v1749_v7 = vsel %vm909_vm1, %v2293_v6, 0.0  ;;  %v1729_v51 = vpop.f32.mrb[21].mxu1  ;;  %v1644_v12 = vadd.f32 %v1643_v56, %v1642_v54 }
 0x617   :  { %v1748_v55 = vsel %vm909_vm1, %v1729_v51, 0.0 }
 0x618   :  { %v1750_v8 = vadd.f32 %v1749_v7, %v1748_v55  ;;  %v1645_v16 = vrot.slane %v1644_v12, 1 }
 0x619   :  { %v2296_v9 = vpop.f32.mrb[22].mxu1 }
 0x61a   :  { %v1739_v10 = vpop.f32.mrb[23].mxu1  ;;  %v1753_v14 = vsel %vm909_vm1, %v2296_v9, 0.0  ;;  %v1646_v19 = vadd.f32 %v1645_v16, %v1644_v12 }
 0x61b   :  { %v1751_v11 = vsel %vm909_vm1, %v1739_v10, 0.0 }
 0x61c   :  { %v1752_v13 = vadd.f32 %v1751_v11, %v1750_v8  ;;  %v1761_v22 = vmul.f32 0.001953125, %v1646_v19 }
 0x61e   :  { %v1754_v15 = vadd.f32 %v1753_v14, %v1752_v13  ;;  %v1763_v25 = vmul.f32 %v1761_v22, %v1761_v22 }
 0x620   :  { %v1755_v17 = vrot.slane %v1754_v15, 4 }
 0x622   :  { %v1756_v18 = vadd.f32 %v1755_v17, %v1754_v15 }
 0x624   :  { %v1757_v20 = vrot.slane %v1756_v18, 2 }
 0x626   :  { %v1758_v21 = vadd.f32 %v1757_v20, %v1756_v18 }
 0x628   :  { %v1759_v23 = vrot.slane %v1758_v21, 1 }
 0x62a   :  { %v1760_v24 = vadd.f32 %v1759_v23, %v1758_v21 }
 0x62c   :  { %v1762_v26 = vmul.f32 0.001953125, %v1760_v24 }
 0x62e   :  { %v1764_v27 = vsub.f32 %v1762_v26, %v1763_v25 }
 0x630   :  { %v1765_v28 = vmax.f32 %v1764_v27, 0.0 }
 0x632   :  { %v1766_v29 = vadd.f32 1e-05, %v1765_v28 }
 0x634   :  { %2460 = vrsqrt.f32 %v1766_v29 }
 0x63e   :  { %v2461_v31 = vpop.eup %2460 }
 0x63f   :  { %v1768_v32 = vmul.f32 %v2461_v31, %v1527_v30 }
 0x641   :  { %v1773_v34 = vrot.slane %v1768_v32, %v2901_v42  ;;  %v1779_v35 = vmul.f32 %v1768_v32, %v1761_v22 }
 0x643   :  { %v1780_v36 = vsub.f32 %v1528_v33, %v1779_v35  ;;  %v1775_v37 = vmul.f32 %v2979_v47, %v1773_v34  ;;  %v1776_v38 = vmul.f32 %v2981_v52, %v1773_v34  ;;  %v1777_v39 = vmul.f32 %v2985_v53, %v1773_v34 }
 0x644   :  { %v1778_v40 = vmul.f32 %v2992_v57, %v1773_v34 }
 0x645   :  { %v1785_v41 = vrot.slane %v1780_v36, %v2901_v42 }
 0x647   :  { %v1787_v44 = vadd.f32 %v1785_v41, %v1775_v37  ;;  %v1788_v49 = vadd.f32 %v1785_v41, %v1776_v38  ;;  %v1789_v50 = vadd.f32 %v1785_v41, %v1777_v39  ;;  %v1790_v58 = vadd.f32 %v1785_v41, %v1778_v40 }
 0x649   :  { %v1791_v43 = vmax.f32 %v1787_v44, 0.0  ;;  %v1792_v59 = vmax.f32 %v1788_v49, 0.0  ;;  %v1793_v45 = vmax.f32 %v1789_v50, 0.0  ;;  %v1794_v48 = vmax.f32 %v1790_v58, 0.0 }
 0x64b   :  { %1795 = vst.msk [vmem:[%s3064_s14] sm:$0xff] %vm909_vm1, %v1791_v43  ;;  %1796 = vst.msk [vmem:[%s3064_s14 + $0x8] sm:$0xff] %vm909_vm1, %v1792_v59 }
 0x64c   :  { %1797 = vst.msk [vmem:[%s3064_s14 + $0x10] sm:$0xff] %vm909_vm1, %v1793_v45  ;;  %1798 = vst.msk [vmem:[%s3064_s14 + $0x18] sm:$0xff] %vm909_vm1, %v1794_v48 }

</bundles_post_ra>
